<compile_context>
chip_gen: v7x
topology: tpu7x:2x2x1
jax: 0.10.0
libtpu: 0.0.40
codegen_flags: <defaults>
</compile_context>

<pallas_src>
import functools

import jax
import jax.numpy as jnp
from jax.experimental import pallas as pl
from jax.experimental.pallas import tpu as pltpu

PAD_ID = 0
UNK_ID = 3          # UNKID in the reference script
ABS_ID = 5          # abs_id (module default -100 never matches token ids; use a real id)
SMOOTHING = 0.1
ENTROPY_CONTRIB = 1.0
_NEG_BIAS = -1.0e30  # bias of padded vocab columns: exp() underflows to exactly 0


def _round_up(x, m):
    return (x + m - 1) // m * m


def _vmem_limit_bytes():
    """Generation-aware scoped-VMEM limit (physical capacity minus headroom)."""
    cap = 64 * 1024 * 1024
    try:
        info = pltpu.get_tpu_info()
        cap = int(getattr(info, "vmem_capacity_bytes", cap))
    except Exception:
        pass
    return max(min(cap, 128 * 1024 * 1024) - 16 * 1024 * 1024, 32 * 1024 * 1024)


def _kernel_vmem_estimate(tm, tn, d):
    """Rough VMEM footprint of one grid step: double-buffered blocks + scratch + temps."""
    lane = 128
    inputs = 2 * (3 * tm * d * 2 + 3 * d * tn * 2 + 3 * tn * 4 + tm * lane * 4)
    outputs = 2 * (2 * tm * tn * 4 + 3 * tm * lane * 4)
    scratch = 10 * tm * lane * 4
    temps = 8 * tm * tn * 4     # lg_mod/adv/lm, exp terms, iota, masks
    return inputs + outputs + scratch + temps


def _choose_tiles(m, d, v, budget):
    """Largest (row, vocab) tile that fits the VMEM budget; tm % 8 == 0, tn % 128 == 0."""
    m_cap = _round_up(max(m, 8), 8)
    v_cap = _round_up(max(v, 128), 128)
    candidates = [(1024, 512), (1024, 256), (512, 512), (512, 256),
                  (256, 256), (128, 256), (128, 128), (64, 128),
                  (32, 128), (16, 128), (8, 128)]
    for tm, tn in candidates:
        tm = min(tm, m_cap)
        tn = min(tn, v_cap)
        if _kernel_vmem_estimate(tm, tn, d) <= budget:
            return tm, tn
    return 8, min(128, v_cap)


# --------------------------------------------------------------------------
# Fused kernel: batched outlin projection + online-softmax CE / argmax / KL.
# --------------------------------------------------------------------------
def _fused_kernel(x_ref, w_ref, b_ref, gold_ref,
                  logits_ref, ce_ref, pred_ref, kl_ref,
                  m_mod, se_mod, sum_mod, gold_logit, amax_idx,
                  m_lm, se_lm, m_adv, se_adv, s_kl,
                  *, vocab_real, smoothing, has_pad_cols):
    j = pl.program_id(1)

    @pl.when(j == 0)
    def _init():
        neg = jnp.full(m_mod.shape, -jnp.inf, jnp.float32)
        zero = jnp.zeros(m_mod.shape, jnp.float32)
        m_mod[...] = neg
        se_mod[...] = zero
        sum_mod[...] = zero
        gold_logit[...] = zero
        amax_idx[...] = jnp.zeros(amax_idx.shape, jnp.int32)
        m_lm[...] = neg
        se_lm[...] = zero
        m_adv[...] = neg
        se_adv[...] = zero
        s_kl[...] = zero

    # --- projections on the MXU (bf16 operands, f32 accumulation) -----------
    lg_mod = jnp.dot(x_ref[0], w_ref[0], preferred_element_type=jnp.float32) + b_ref[0]
    lg_adv = jnp.dot(x_ref[1], w_ref[1], preferred_element_type=jnp.float32) + b_ref[1]
    lg_lm = jnp.dot(x_ref[2], w_ref[2], preferred_element_type=jnp.float32) + b_ref[2]

    # model / adv logits are returned by the module -> stream them out tile-by-tile.
    logits_ref[0, :, :] = lg_mod
    logits_ref[1, :, :] = lg_adv

    tm, tn = lg_mod.shape
    col0 = j * tn
    iota = col0 + jax.lax.broadcasted_iota(jnp.int32, (tm, tn), 1)
    gold = gold_ref[...]                                  # [tm, 1] int32

    # --- model stream: online softmax stats for CE + running argmax ---------
    m_old = m_mod[...]
    tmax = jnp.max(lg_mod, axis=-1, keepdims=True)
    m_new = jnp.maximum(m_old, tmax)
    scale = jnp.exp(m_old - m_new)
    se_mod[...] = se_mod[...] * scale + jnp.sum(jnp.exp(lg_mod - m_new), -1, keepdims=True)
    if has_pad_cols:
        sum_mod[...] += jnp.sum(jnp.where(iota < vocab_real, lg_mod, 0.0), -1, keepdims=True)
    else:
        sum_mod[...] += jnp.sum(lg_mod, -1, keepdims=True)
    gold_logit[...] += jnp.sum(jnp.where(iota == gold, lg_mod, 0.0), -1, keepdims=True)
    tile_idx = jnp.min(jnp.where(lg_mod >= tmax, iota, jnp.int32(2 ** 30)),
                       axis=-1, keepdims=True)
    amax_idx[...] = jnp.where(tmax > m_old, tile_idx, amax_idx[...])
    m_mod[...] = m_new

    # --- lm / adv streams: online stats for KL(softmax(lm) || softmax(adv)) --
    ml_old = m_lm[...]
    tmax_lm = jnp.max(lg_lm, axis=-1, keepdims=True)
    ml_new = jnp.maximum(ml_old, tmax_lm)
    scale_lm = jnp.exp(ml_old - ml_new)
    e_lm = jnp.exp(lg_lm - ml_new)
    se_lm[...] = se_lm[...] * scale_lm + jnp.sum(e_lm, -1, keepdims=True)
    s_kl[...] = s_kl[...] * scale_lm + jnp.sum(e_lm * (lg_lm - lg_adv), -1, keepdims=True)
    m_lm[...] = ml_new

    ma_old = m_adv[...]
    tmax_adv = jnp.max(lg_adv, axis=-1, keepdims=True)
    ma_new = jnp.maximum(ma_old, tmax_adv)
    se_adv[...] = (se_adv[...] * jnp.exp(ma_old - ma_new)
                   + jnp.sum(jnp.exp(lg_adv - ma_new), -1, keepdims=True))
    m_adv[...] = ma_new

    @pl.when(j == pl.num_programs(1) - 1)
    def _finalize():
        logz_mod = jnp.log(se_mod[...]) + m_mod[...]
        gold_logp = gold_logit[...] - logz_mod
        mean_logp = sum_mod[...] * (1.0 / vocab_real) - logz_mod
        # TODO(synk): parseq CELoss smoothing variant unverified (uniform over all V here).
        ce_ref[...] = -((1.0 - smoothing) * gold_logp + smoothing * mean_logp)
        pred_ref[...] = amax_idx[...]
        logz_lm = jnp.log(se_lm[...]) + m_lm[...]
        logz_adv = jnp.log(se_adv[...]) + m_adv[...]
        # sum_v p_lm (log p_lm - log p_adv)  (exact divide; se_lm is per-row only)
        kl_ref[...] = s_kl[...] / se_lm[...] - logz_lm + logz_adv


def fused_projection_metrics(h3, w3, b3, gold, *, tm, tn, vocab_real, vmem_limit):
    """h3: [3, M_pad, D] bf16, w3: [3, D, V_pad] bf16, b3: [3, 1, V_pad] f32,
    gold: [M_pad, 1] i32 -> (logits[2, M_pad, V_pad] f32, ce, pred, kl each [M_pad, 1])."""
    G, M_pad, D = h3.shape
    assert G == 3
    V_pad = w3.shape[2]
    ni, nj = M_pad // tm, V_pad // tn

    kernel = functools.partial(
        _fused_kernel, vocab_real=vocab_real, smoothing=SMOOTHING,
        has_pad_cols=(V_pad != vocab_real))

    cost = pl.CostEstimate(
        flops=int(6 * M_pad * D * V_pad + 24 * M_pad * V_pad),
        transcendentals=int(3 * M_pad * V_pad),
        bytes_accessed=int(h3.size * 2 + ni * (w3.size * 2 + b3.size * 4)
                           + 2 * M_pad * V_pad * 4 + M_pad * 4 * 4),
    )

    return pl.pallas_call(
        kernel,
        out_shape=(
            jax.ShapeDtypeStruct((2, M_pad, V_pad), jnp.float32),  # model + adv logits
            jax.ShapeDtypeStruct((M_pad, 1), jnp.float32),         # per-position CE
            jax.ShapeDtypeStruct((M_pad, 1), jnp.int32),           # predactions
            jax.ShapeDtypeStruct((M_pad, 1), jnp.float32),         # per-position KL
        ),
        grid_spec=pltpu.PrefetchScalarGridSpec(
            num_scalar_prefetch=0,
            grid=(ni, nj),
            in_specs=[
                pl.BlockSpec((3, tm, D), lambda i, j: (0, i, 0)),   # all 3 hidden streams
                pl.BlockSpec((3, D, tn), lambda i, j: (0, 0, j)),   # vocab tile of W
                pl.BlockSpec((3, 1, tn), lambda i, j: (0, 0, j)),   # vocab tile of bias
                pl.BlockSpec((tm, 1), lambda i, j: (i, 0)),         # gold ids of this row tile
            ],
            out_specs=[
                pl.BlockSpec((2, tm, tn), lambda i, j: (0, i, j)),
                pl.BlockSpec((tm, 1), lambda i, j: (i, 0)),
                pl.BlockSpec((tm, 1), lambda i, j: (i, 0)),
                pl.BlockSpec((tm, 1), lambda i, j: (i, 0)),
            ],
            scratch_shapes=[pltpu.VMEM((tm, 1), jnp.float32)] * 4   # m/se/sum/gold (model)
                          + [pltpu.VMEM((tm, 1), jnp.int32)]        # running argmax index
                          + [pltpu.VMEM((tm, 1), jnp.float32)] * 5, # m/se (lm), m/se (adv), S_kl
        ),
        compiler_params=pltpu.CompilerParams(
            dimension_semantics=("parallel", "arbitrary"),
            vmem_limit_bytes=vmem_limit,
        ),
        cost_estimate=cost,
    )(h3, w3, b3, gold)


# --------------------------------------------------------------------------
# BartGenerator stand-in (glue, plain JAX) + GeneratorTrain forward
# --------------------------------------------------------------------------
def bart_hidden_states(params, input_ids, decoder_input_ids, attention_mask):
    # TODO(synk): the full BART encoder/decoder transformer stack is not shown in the
    # module; replaced by a deterministic masked-mean-pool embedding stand-in.
    enc = params["emb_enc"][input_ids]                         # [B, S, D]
    if attention_mask is None:
        mask = jnp.ones(input_ids.shape, jnp.float32)
    else:
        mask = attention_mask.astype(jnp.float32)
    ctx = jnp.sum(enc * mask[..., None], axis=1) / jnp.maximum(
        jnp.sum(mask, axis=1, keepdims=True), 1.0)             # [B, D]
    dec = params["emb_dec"][decoder_input_ids]                 # [B, T, D]
    return jnp.tanh(dec + ctx[:, None, :])                     # [B, T, D]


def generator_train_forward(params, input_ids, output_ids, adv_output_ids):
    attn = input_ids != PAD_ID

    h_model = bart_hidden_states(params["model"], input_ids, output_ids, attn)
    h_adv = bart_hidden_states(params["advmodel"], input_ids, adv_output_ids, attn)
    h_lm = bart_hidden_states(params["lm_model"], input_ids, adv_output_ids, None)

    B, T, D = h_model.shape
    V = params["model"]["w_out"].shape[1]
    M = B * T

    vmem_limit = _vmem_limit_bytes()
    tm, tn = _choose_tiles(M, D, V, budget=(2 * vmem_limit) // 3)
    M_pad = _round_up(M, tm)
    V_pad = _round_up(V, tn)

    names = ("model", "advmodel", "lm_model")
    # Stack the 3 generators on a leading axis: one fused kernel instead of 3 launches.
    h3 = jnp.stack([h_model, h_adv, h_lm], axis=0).reshape(3, M, D)
    h3 = jnp.pad(h3, ((0, 0), (0, M_pad - M), (0, 0))).astype(jnp.bfloat16)
    w3 = jnp.stack([params[n]["w_out"] for n in names], axis=0)
    w3 = jnp.pad(w3, ((0, 0), (0, 0), (0, V_pad - V))).astype(jnp.bfloat16)
    b3 = jnp.stack([params[n]["b_out"] for n in names], axis=0)
    b3 = jnp.pad(b3, ((0, 0), (0, V_pad - V)), constant_values=_NEG_BIAS)
    b3 = b3.reshape(3, 1, V_pad).astype(jnp.float32)

    # Gold aligned to all T decoder positions (position T-1 masked out via PAD).
    gold_full = jnp.concatenate(
        [output_ids[:, 1:], jnp.full((B, 1), PAD_ID, output_ids.dtype)], axis=1
    ).astype(jnp.int32)                                        # [B, T]
    gold_pad = jnp.pad(gold_full.reshape(-1), (0, M_pad - M),
                       constant_values=PAD_ID).reshape(M_pad, 1)

    logits2, ce_pos, pred, kl_pos = fused_projection_metrics(
        h3, w3, b3, gold_pad, tm=tm, tn=tn, vocab_real=V, vmem_limit=vmem_limit)

    probs = logits2[0, :M, :V].reshape(B, T, V)                # model logits (returned)
    advprobs = logits2[1, :M, :V].reshape(B, T, V)             # advmodel logits (returned)
    ce_pos = ce_pos[:M, 0].reshape(B, T)
    pred = pred[:M, 0].reshape(B, T)
    kl_pos = kl_pos[:M, 0].reshape(B, T)

    # CELoss (label smoothing, ignore pad) ---------------------------------
    valid = (gold_full != PAD_ID).astype(jnp.float32)
    n_valid = jnp.maximum(jnp.sum(valid), 1.0)
    ce = jnp.sum(ce_pos * valid) / n_valid

    # SeqAccuracies --------------------------------------------------------
    correct = ((pred == gold_full) & (pred != UNK_ID)).astype(jnp.float32) * valid
    elem_acc = jnp.sum(correct) / n_valid
    seq_ok = jnp.all((correct + (1.0 - valid)) > 0.5, axis=1).astype(jnp.float32)
    seq_acc = jnp.mean(seq_ok)

    # TODO(synk): TreeAccuracy requires tensor2tree string/tree parsing — no Pallas equivalent.

    # KLLoss on abstract-token positions -----------------------------------
    # TODO(synk): KLLoss source not shown; direction matches
    #             F.kl_div(log_softmax(advprobs), softmax(lmprobs)), per-position sum over V.
    absmask = jnp.concatenate(
        [(output_ids == ABS_ID)[:, 1:], jnp.zeros((B, 1), bool)], axis=1
    ).astype(jnp.float32)
    n_abs = jnp.maximum(jnp.sum(absmask), 1.0)
    entropy = ENTROPY_CONTRIB * jnp.sum(kl_pos * absmask) / n_abs

    outputs = {"loss": ce + entropy, "ce": ce, "elem_acc": elem_acc,
               "seq_acc": seq_acc, "kl": entropy}
    return outputs, (probs, advprobs)


# --------------------------------------------------------------------------
def init_bart_params(key, vocab, d_model):
    k1, k2, k3 = jax.random.split(key, 3)
    return {
        "emb_enc": 0.02 * jax.random.normal(k1, (vocab, d_model), jnp.float32),
        "emb_dec": 0.02 * jax.random.normal(k2, (vocab, d_model), jnp.float32),
        "w_out": 0.02 * jax.random.normal(k3, (d_model, vocab), jnp.float32),
        "b_out": jnp.zeros((vocab,), jnp.float32),
    }


if __name__ == "__main__":
    B, S_ENC, T_DEC, D, V = 2, 10, 9, 32, 256

    root = jax.random.PRNGKey(0)
    k_model, k_adv, k_lm, k_in, k_out, k_adv_out = jax.random.split(root, 6)

    params = {
        "model": init_bart_params(k_model, V, D),
        "advmodel": init_bart_params(k_adv, V, D),
        "lm_model": init_bart_params(k_lm, V, D),
    }

    input_ids = jax.random.randint(k_in, (B, S_ENC), 6, V, dtype=jnp.int32)
    input_ids = input_ids.at[1, -2:].set(PAD_ID)               # some padding

    output_ids = jax.random.randint(k_out, (B, T_DEC), 6, V, dtype=jnp.int32)
    output_ids = output_ids.at[:, 0].set(1)                    # BOS
    output_ids = output_ids.at[0, 3].set(ABS_ID)               # abstract tokens
    output_ids = output_ids.at[1, 5].set(ABS_ID)
    output_ids = output_ids.at[1, -1].set(PAD_ID)              # padded tail

    adv_output_ids = jax.random.randint(k_adv_out, (B, T_DEC), 6, V, dtype=jnp.int32)
    adv_output_ids = adv_output_ids.at[:, 0].set(1)

    fwd = jax.jit(generator_train_forward)
    outputs, rets = fwd(params, input_ids, output_ids, adv_output_ids)
    jax.block_until_ready(outputs)
    jax.block_until_ready(rets)

    print("KERNEL_OK")
</pallas_src>

<mosaic_0001>
module attributes {stable_mosaic.version = 11 : i64} {
  func.func @_fused_kernel(%arg0: i32, %arg1: i32, %arg2: memref<3x24x32xbf16, #tpu.memory_space<vmem>>, %arg3: memref<3x32x256xbf16, #tpu.memory_space<vmem>>, %arg4: memref<3x1x256xf32, #tpu.memory_space<vmem>>, %arg5: memref<24x1xi32, #tpu.memory_space<vmem>>, %arg6: memref<2x24x256xf32, #tpu.memory_space<vmem>>, %arg7: memref<24x1xf32, #tpu.memory_space<vmem>>, %arg8: memref<24x1xi32, #tpu.memory_space<vmem>>, %arg9: memref<24x1xf32, #tpu.memory_space<vmem>>, %arg10: memref<24x1xf32, #tpu.memory_space<vmem>>, %arg11: memref<24x1xf32, #tpu.memory_space<vmem>>, %arg12: memref<24x1xf32, #tpu.memory_space<vmem>>, %arg13: memref<24x1xf32, #tpu.memory_space<vmem>>, %arg14: memref<24x1xi32, #tpu.memory_space<vmem>>, %arg15: memref<24x1xf32, #tpu.memory_space<vmem>>, %arg16: memref<24x1xf32, #tpu.memory_space<vmem>>, %arg17: memref<24x1xf32, #tpu.memory_space<vmem>>, %arg18: memref<24x1xf32, #tpu.memory_space<vmem>>, %arg19: memref<24x1xf32, #tpu.memory_space<vmem>>) attributes {dimension_semantics = [#tpu.dimension_semantics<parallel>, #tpu.dimension_semantics<arbitrary>], iteration_bounds = array<i64: 1, 1>, scalar_prefetch = 0 : i64, scratch_operands = 10 : i64, tpu.core_type = #tpu.core_type<tc>, window_params = [{transform_indices = @transform_0, window_bounds = array<i64: 3, 24, 32>}, {transform_indices = @transform_1, window_bounds = array<i64: 3, 32, 256>}, {transform_indices = @transform_2, window_bounds = array<i64: 3, 1, 256>}, {transform_indices = @transform_3, window_bounds = array<i64: 24, 1>}, {transform_indices = @transform_4, window_bounds = array<i64: 2, 24, 256>}, {transform_indices = @transform_5, window_bounds = array<i64: 24, 1>}, {transform_indices = @transform_6, window_bounds = array<i64: 24, 1>}, {transform_indices = @transform_7, window_bounds = array<i64: 24, 1>}]} {
    %c0_i32 = arith.constant 0 : i32
    %0 = arith.cmpi eq, %arg1, %c0_i32 : i32
    %1 = arith.extui %0 : i1 to i32
    %c0_i32_0 = arith.constant 0 : i32
    %2 = arith.cmpi ne, %1, %c0_i32_0 : i32
    scf.if %2 {
      %cst_88 = arith.constant 0xFF800000 : f32
      %124 = vector.broadcast %cst_88 : f32 to vector<24x1xf32>
      %cst_89 = arith.constant 0.000000e+00 : f32
      %125 = vector.broadcast %cst_89 : f32 to vector<24x1xf32>
      %c0_90 = arith.constant 0 : index
      %c0_91 = arith.constant 0 : index
      %126 = vector.load %arg10[%c0_90, %c0_91] : memref<24x1xf32, #tpu.memory_space<vmem>>, vector<24x1xf32>
      tpu.vector_store %arg10[%c0_90, %c0_91], %124 {strides = array<i32>} : memref<24x1xf32, #tpu.memory_space<vmem>>, vector<24x1xf32>,
      %c0_92 = arith.constant 0 : index
      %c0_93 = arith.constant 0 : index
      %127 = vector.load %arg11[%c0_92, %c0_93] : memref<24x1xf32, #tpu.memory_space<vmem>>, vector<24x1xf32>
      tpu.vector_store %arg11[%c0_92, %c0_93], %125 {strides = array<i32>} : memref<24x1xf32, #tpu.memory_space<vmem>>, vector<24x1xf32>,
      %c0_94 = arith.constant 0 : index
      %c0_95 = arith.constant 0 : index
      %128 = vector.load %arg12[%c0_94, %c0_95] : memref<24x1xf32, #tpu.memory_space<vmem>>, vector<24x1xf32>
      tpu.vector_store %arg12[%c0_94, %c0_95], %125 {strides = array<i32>} : memref<24x1xf32, #tpu.memory_space<vmem>>, vector<24x1xf32>,
      %c0_96 = arith.constant 0 : index
      %c0_97 = arith.constant 0 : index
      %129 = vector.load %arg13[%c0_96, %c0_97] : memref<24x1xf32, #tpu.memory_space<vmem>>, vector<24x1xf32>
      tpu.vector_store %arg13[%c0_96, %c0_97], %125 {strides = array<i32>} : memref<24x1xf32, #tpu.memory_space<vmem>>, vector<24x1xf32>,
      %c0_i32_98 = arith.constant 0 : i32
      %130 = vector.broadcast %c0_i32_98 : i32 to vector<24x1xi32>
      %c0_99 = arith.constant 0 : index
      %c0_100 = arith.constant 0 : index
      %131 = vector.load %arg14[%c0_99, %c0_100] : memref<24x1xi32, #tpu.memory_space<vmem>>, vector<24x1xi32>
      tpu.vector_store %arg14[%c0_99, %c0_100], %130 {strides = array<i32>} : memref<24x1xi32, #tpu.memory_space<vmem>>, vector<24x1xi32>,
      %c0_101 = arith.constant 0 : index
      %c0_102 = arith.constant 0 : index
      %132 = vector.load %arg15[%c0_101, %c0_102] : memref<24x1xf32, #tpu.memory_space<vmem>>, vector<24x1xf32>
      tpu.vector_store %arg15[%c0_101, %c0_102], %124 {strides = array<i32>} : memref<24x1xf32, #tpu.memory_space<vmem>>, vector<24x1xf32>,
      %c0_103 = arith.constant 0 : index
      %c0_104 = arith.constant 0 : index
      %133 = vector.load %arg16[%c0_103, %c0_104] : memref<24x1xf32, #tpu.memory_space<vmem>>, vector<24x1xf32>
      tpu.vector_store %arg16[%c0_103, %c0_104], %125 {strides = array<i32>} : memref<24x1xf32, #tpu.memory_space<vmem>>, vector<24x1xf32>,
      %c0_105 = arith.constant 0 : index
      %c0_106 = arith.constant 0 : index
      %134 = vector.load %arg17[%c0_105, %c0_106] : memref<24x1xf32, #tpu.memory_space<vmem>>, vector<24x1xf32>
      tpu.vector_store %arg17[%c0_105, %c0_106], %124 {strides = array<i32>} : memref<24x1xf32, #tpu.memory_space<vmem>>, vector<24x1xf32>,
      %c0_107 = arith.constant 0 : index
      %c0_108 = arith.constant 0 : index
      %135 = vector.load %arg18[%c0_107, %c0_108] : memref<24x1xf32, #tpu.memory_space<vmem>>, vector<24x1xf32>
      tpu.vector_store %arg18[%c0_107, %c0_108], %125 {strides = array<i32>} : memref<24x1xf32, #tpu.memory_space<vmem>>, vector<24x1xf32>,
      %c0_109 = arith.constant 0 : index
      %c0_110 = arith.constant 0 : index
      %136 = vector.load %arg19[%c0_109, %c0_110] : memref<24x1xf32, #tpu.memory_space<vmem>>, vector<24x1xf32>
      tpu.vector_store %arg19[%c0_109, %c0_110], %125 {strides = array<i32>} : memref<24x1xf32, #tpu.memory_space<vmem>>, vector<24x1xf32>,
    } else {
    }
    %c0 = arith.constant 0 : index
    %c0_1 = arith.constant 0 : index
    %c0_2 = arith.constant 0 : index
    %3 = vector.load %arg2[%c0, %c0_1, %c0_2] : memref<3x24x32xbf16, #tpu.memory_space<vmem>>, vector<1x24x32xbf16>
    %4 = vector.shape_cast %3 : vector<1x24x32xbf16> to vector<24x32xbf16>
    %c0_3 = arith.constant 0 : index
    %c0_4 = arith.constant 0 : index
    %c0_5 = arith.constant 0 : index
    %5 = vector.load %arg3[%c0_3, %c0_4, %c0_5] : memref<3x32x256xbf16, #tpu.memory_space<vmem>>, vector<1x32x256xbf16>
    %6 = vector.shape_cast %5 : vector<1x32x256xbf16> to vector<32x256xbf16>
    %cst = arith.constant dense<0.000000e+00> : vector<24x256xf32>
    %7 = tpu.matmul %4, %6, %cst {dimension_numbers = #tpu.dot_dimension_numbers<[1], [0], [0], [1], [0, 0, 1, 1], [], []>} : vector<24x32xbf16>, vector<32x256xbf16>, vector<24x256xf32> -> vector<24x256xf32>
    %c0_6 = arith.constant 0 : index
    %c0_7 = arith.constant 0 : index
    %c0_8 = arith.constant 0 : index
    %8 = vector.load %arg4[%c0_6, %c0_7, %c0_8] : memref<3x1x256xf32, #tpu.memory_space<vmem>>, vector<1x1x256xf32>
    %9 = vector.shape_cast %8 : vector<1x1x256xf32> to vector<1x256xf32>
    %10 = vector.broadcast %9 : vector<1x256xf32> to vector<24x256xf32>
    %11 = arith.addf %7, %10 : vector<24x256xf32>
    %c1 = arith.constant 1 : index
    %c0_9 = arith.constant 0 : index
    %c0_10 = arith.constant 0 : index
    %12 = vector.load %arg2[%c1, %c0_9, %c0_10] : memref<3x24x32xbf16, #tpu.memory_space<vmem>>, vector<1x24x32xbf16>
    %13 = vector.shape_cast %12 : vector<1x24x32xbf16> to vector<24x32xbf16>
    %c1_11 = arith.constant 1 : index
    %c0_12 = arith.constant 0 : index
    %c0_13 = arith.constant 0 : index
    %14 = vector.load %arg3[%c1_11, %c0_12, %c0_13] : memref<3x32x256xbf16, #tpu.memory_space<vmem>>, vector<1x32x256xbf16>
    %15 = vector.shape_cast %14 : vector<1x32x256xbf16> to vector<32x256xbf16>
    %cst_14 = arith.constant dense<0.000000e+00> : vector<24x256xf32>
    %16 = tpu.matmul %13, %15, %cst_14 {dimension_numbers = #tpu.dot_dimension_numbers<[1], [0], [0], [1], [0, 0, 1, 1], [], []>} : vector<24x32xbf16>, vector<32x256xbf16>, vector<24x256xf32> -> vector<24x256xf32>
    %c1_15 = arith.constant 1 : index
    %c0_16 = arith.constant 0 : index
    %c0_17 = arith.constant 0 : index
    %17 = vector.load %arg4[%c1_15, %c0_16, %c0_17] : memref<3x1x256xf32, #tpu.memory_space<vmem>>, vector<1x1x256xf32>
    %18 = vector.shape_cast %17 : vector<1x1x256xf32> to vector<1x256xf32>
    %19 = vector.broadcast %18 : vector<1x256xf32> to vector<24x256xf32>
    %20 = arith.addf %16, %19 : vector<24x256xf32>
    %c2 = arith.constant 2 : index
    %c0_18 = arith.constant 0 : index
    %c0_19 = arith.constant 0 : index
    %21 = vector.load %arg2[%c2, %c0_18, %c0_19] : memref<3x24x32xbf16, #tpu.memory_space<vmem>>, vector<1x24x32xbf16>
    %22 = vector.shape_cast %21 : vector<1x24x32xbf16> to vector<24x32xbf16>
    %c2_20 = arith.constant 2 : index
    %c0_21 = arith.constant 0 : index
    %c0_22 = arith.constant 0 : index
    %23 = vector.load %arg3[%c2_20, %c0_21, %c0_22] : memref<3x32x256xbf16, #tpu.memory_space<vmem>>, vector<1x32x256xbf16>
    %24 = vector.shape_cast %23 : vector<1x32x256xbf16> to vector<32x256xbf16>
    %cst_23 = arith.constant dense<0.000000e+00> : vector<24x256xf32>
    %25 = tpu.matmul %22, %24, %cst_23 {dimension_numbers = #tpu.dot_dimension_numbers<[1], [0], [0], [1], [0, 0, 1, 1], [], []>} : vector<24x32xbf16>, vector<32x256xbf16>, vector<24x256xf32> -> vector<24x256xf32>
    %c2_24 = arith.constant 2 : index
    %c0_25 = arith.constant 0 : index
    %c0_26 = arith.constant 0 : index
    %26 = vector.load %arg4[%c2_24, %c0_25, %c0_26] : memref<3x1x256xf32, #tpu.memory_space<vmem>>, vector<1x1x256xf32>
    %27 = vector.shape_cast %26 : vector<1x1x256xf32> to vector<1x256xf32>
    %28 = vector.broadcast %27 : vector<1x256xf32> to vector<24x256xf32>
    %29 = arith.addf %25, %28 : vector<24x256xf32>
    %c0_27 = arith.constant 0 : index
    %c0_28 = arith.constant 0 : index
    %c0_29 = arith.constant 0 : index
    %30 = vector.load %arg6[%c0_27, %c0_28, %c0_29] : memref<2x24x256xf32, #tpu.memory_space<vmem>>, vector<1x24x256xf32>
    %31 = vector.shape_cast %30 : vector<1x24x256xf32> to vector<24x256xf32>
    %32 = vector.shape_cast %11 : vector<24x256xf32> to vector<1x24x256xf32>
    tpu.vector_store %arg6[%c0_27, %c0_28, %c0_29], %32 {strides = array<i32>} : memref<2x24x256xf32, #tpu.memory_space<vmem>>, vector<1x24x256xf32>,
    %c1_30 = arith.constant 1 : index
    %c0_31 = arith.constant 0 : index
    %c0_32 = arith.constant 0 : index
    %33 = vector.load %arg6[%c1_30, %c0_31, %c0_32] : memref<2x24x256xf32, #tpu.memory_space<vmem>>, vector<1x24x256xf32>
    %34 = vector.shape_cast %33 : vector<1x24x256xf32> to vector<24x256xf32>
    %35 = vector.shape_cast %20 : vector<24x256xf32> to vector<1x24x256xf32>
    tpu.vector_store %arg6[%c1_30, %c0_31, %c0_32], %35 {strides = array<i32>} : memref<2x24x256xf32, #tpu.memory_space<vmem>>, vector<1x24x256xf32>,
    %c256_i32 = arith.constant 256 : i32
    %36 = arith.muli %arg1, %c256_i32 : i32
    %37 = tpu.iota {dimensions = array<i32: 1>} : vector<24x256xi32>
    %38 = vector.broadcast %36 : i32 to vector<24x256xi32>
    %39 = arith.addi %38, %37 : vector<24x256xi32>
    %c0_33 = arith.constant 0 : index
    %c0_34 = arith.constant 0 : index
    %40 = vector.load %arg5[%c0_33, %c0_34] : memref<24x1xi32, #tpu.memory_space<vmem>>, vector<24x1xi32>
    %c0_35 = arith.constant 0 : index
    %c0_36 = arith.constant 0 : index
    %41 = vector.load %arg10[%c0_35, %c0_36] : memref<24x1xf32, #tpu.memory_space<vmem>>, vector<24x1xf32>
    %cst_37 = arith.constant dense<0xFF800000> : vector<24xf32>
    %42 = vector.multi_reduction <maximumf>, %11, %cst_37 [1] : vector<24x256xf32> to vector<24xf32>
    %43 = vector.shape_cast %42 : vector<24xf32> to vector<24x1xf32>
    %44 = arith.maximumf %41, %43 : vector<24x1xf32>
    %45 = arith.subf %41, %44 : vector<24x1xf32>
    %46 = math.exp %45 : vector<24x1xf32>
    %c0_38 = arith.constant 0 : index
    %c0_39 = arith.constant 0 : index
    %47 = vector.load %arg11[%c0_38, %c0_39] : memref<24x1xf32, #tpu.memory_space<vmem>>, vector<24x1xf32>
    %48 = arith.mulf %47, %46 : vector<24x1xf32>
    %49 = vector.broadcast %44 : vector<24x1xf32> to vector<24x256xf32>
    %50 = arith.subf %11, %49 : vector<24x256xf32>
    %51 = math.exp %50 : vector<24x256xf32>
    %cst_40 = arith.constant dense<0.000000e+00> : vector<24xf32>
    %52 = vector.multi_reduction <add>, %51, %cst_40 [1] : vector<24x256xf32> to vector<24xf32>
    %53 = vector.shape_cast %52 : vector<24xf32> to vector<24x1xf32>
    %54 = arith.addf %48, %53 : vector<24x1xf32>
    %c0_41 = arith.constant 0 : index
    %c0_42 = arith.constant 0 : index
    %55 = vector.load %arg11[%c0_41, %c0_42] : memref<24x1xf32, #tpu.memory_space<vmem>>, vector<24x1xf32>
    tpu.vector_store %arg11[%c0_41, %c0_42], %54 {strides = array<i32>} : memref<24x1xf32, #tpu.memory_space<vmem>>, vector<24x1xf32>,
    %c0_43 = arith.constant 0 : index
    %c0_44 = arith.constant 0 : index
    %56 = vector.load %arg12[%c0_43, %c0_44] : memref<24x1xf32, #tpu.memory_space<vmem>>, vector<24x1xf32>
    %cst_45 = arith.constant dense<0.000000e+00> : vector<24xf32>
    %57 = vector.multi_reduction <add>, %11, %cst_45 [1] : vector<24x256xf32> to vector<24xf32>
    %58 = vector.shape_cast %57 : vector<24xf32> to vector<24x1xf32>
    %59 = arith.addf %56, %58 : vector<24x1xf32>
    %c0_46 = arith.constant 0 : index
    %c0_47 = arith.constant 0 : index
    %60 = vector.load %arg12[%c0_46, %c0_47] : memref<24x1xf32, #tpu.memory_space<vmem>>, vector<24x1xf32>
    tpu.vector_store %arg12[%c0_46, %c0_47], %59 {strides = array<i32>} : memref<24x1xf32, #tpu.memory_space<vmem>>, vector<24x1xf32>,
    %c0_48 = arith.constant 0 : index
    %c0_49 = arith.constant 0 : index
    %61 = vector.load %arg13[%c0_48, %c0_49] : memref<24x1xf32, #tpu.memory_space<vmem>>, vector<24x1xf32>
    %62 = vector.broadcast %40 : vector<24x1xi32> to vector<24x256xi32>
    %63 = arith.cmpi eq, %39, %62 : vector<24x256xi32>
    %cst_50 = arith.constant 0.000000e+00 : f32
    %64 = vector.broadcast %cst_50 : f32 to vector<24x256xf32>
    %65 = arith.select %63, %11, %64 : vector<24x256xi1>, vector<24x256xf32>
    %cst_51 = arith.constant dense<0.000000e+00> : vector<24xf32>
    %66 = vector.multi_reduction <add>, %65, %cst_51 [1] : vector<24x256xf32> to vector<24xf32>
    %67 = vector.shape_cast %66 : vector<24xf32> to vector<24x1xf32>
    %68 = arith.addf %61, %67 : vector<24x1xf32>
    %c0_52 = arith.constant 0 : index
    %c0_53 = arith.constant 0 : index
    %69 = vector.load %arg13[%c0_52, %c0_53] : memref<24x1xf32, #tpu.memory_space<vmem>>, vector<24x1xf32>
    tpu.vector_store %arg13[%c0_52, %c0_53], %68 {strides = array<i32>} : memref<24x1xf32, #tpu.memory_space<vmem>>, vector<24x1xf32>,
    %70 = vector.broadcast %43 : vector<24x1xf32> to vector<24x256xf32>
    %71 = arith.cmpf oge, %11, %70 : vector<24x256xf32>
    %c1073741824_i32 = arith.constant 1073741824 : i32
    %72 = vector.broadcast %c1073741824_i32 : i32 to vector<24x256xi32>
    %73 = arith.select %71, %39, %72 : vector<24x256xi1>, vector<24x256xi32>
    %cst_54 = arith.constant dense<2147483647> : vector<24xi32>
    %74 = vector.multi_reduction <minsi>, %73, %cst_54 [1] : vector<24x256xi32> to vector<24xi32>
    %75 = vector.shape_cast %74 : vector<24xi32> to vector<24x1xi32>
    %76 = arith.cmpf ogt, %43, %41 : vector<24x1xf32>
    %c0_55 = arith.constant 0 : index
    %c0_56 = arith.constant 0 : index
    %77 = vector.load %arg14[%c0_55, %c0_56] : memref<24x1xi32, #tpu.memory_space<vmem>>, vector<24x1xi32>
    %78 = arith.select %76, %75, %77 : vector<24x1xi1>, vector<24x1xi32>
    %c0_57 = arith.constant 0 : index
    %c0_58 = arith.constant 0 : index
    %79 = vector.load %arg14[%c0_57, %c0_58] : memref<24x1xi32, #tpu.memory_space<vmem>>, vector<24x1xi32>
    tpu.vector_store %arg14[%c0_57, %c0_58], %78 {strides = array<i32>} : memref<24x1xi32, #tpu.memory_space<vmem>>, vector<24x1xi32>,
    %c0_59 = arith.constant 0 : index
    %c0_60 = arith.constant 0 : index
    %80 = vector.load %arg10[%c0_59, %c0_60] : memref<24x1xf32, #tpu.memory_space<vmem>>, vector<24x1xf32>
    tpu.vector_store %arg10[%c0_59, %c0_60], %44 {strides = array<i32>} : memref<24x1xf32, #tpu.memory_space<vmem>>, vector<24x1xf32>,
    %c0_61 = arith.constant 0 : index
    %c0_62 = arith.constant 0 : index
    %81 = vector.load %arg15[%c0_61, %c0_62] : memref<24x1xf32, #tpu.memory_space<vmem>>, vector<24x1xf32>
    %cst_63 = arith.constant dense<0xFF800000> : vector<24xf32>
    %82 = vector.multi_reduction <maximumf>, %29, %cst_63 [1] : vector<24x256xf32> to vector<24xf32>
    %83 = vector.shape_cast %82 : vector<24xf32> to vector<24x1xf32>
    %84 = arith.maximumf %81, %83 : vector<24x1xf32>
    %85 = arith.subf %81, %84 : vector<24x1xf32>
    %86 = math.exp %85 : vector<24x1xf32>
    %87 = vector.broadcast %84 : vector<24x1xf32> to vector<24x256xf32>
    %88 = arith.subf %29, %87 : vector<24x256xf32>
    %89 = math.exp %88 : vector<24x256xf32>
    %c0_64 = arith.constant 0 : index
    %c0_65 = arith.constant 0 : index
    %90 = vector.load %arg16[%c0_64, %c0_65] : memref<24x1xf32, #tpu.memory_space<vmem>>, vector<24x1xf32>
    %91 = arith.mulf %90, %86 : vector<24x1xf32>
    %cst_66 = arith.constant dense<0.000000e+00> : vector<24xf32>
    %92 = vector.multi_reduction <add>, %89, %cst_66 [1] : vector<24x256xf32> to vector<24xf32>
    %93 = vector.shape_cast %92 : vector<24xf32> to vector<24x1xf32>
    %94 = arith.addf %91, %93 : vector<24x1xf32>
    %c0_67 = arith.constant 0 : index
    %c0_68 = arith.constant 0 : index
    %95 = vector.load %arg16[%c0_67, %c0_68] : memref<24x1xf32, #tpu.memory_space<vmem>>, vector<24x1xf32>
    tpu.vector_store %arg16[%c0_67, %c0_68], %94 {strides = array<i32>} : memref<24x1xf32, #tpu.memory_space<vmem>>, vector<24x1xf32>,
    %c0_69 = arith.constant 0 : index
    %c0_70 = arith.constant 0 : index
    %96 = vector.load %arg19[%c0_69, %c0_70] : memref<24x1xf32, #tpu.memory_space<vmem>>, vector<24x1xf32>
    %97 = arith.mulf %96, %86 : vector<24x1xf32>
    %98 = arith.subf %29, %20 : vector<24x256xf32>
    %99 = arith.mulf %89, %98 : vector<24x256xf32>
    %cst_71 = arith.constant dense<0.000000e+00> : vector<24xf32>
    %100 = vector.multi_reduction <add>, %99, %cst_71 [1] : vector<24x256xf32> to vector<24xf32>
    %101 = vector.shape_cast %100 : vector<24xf32> to vector<24x1xf32>
    %102 = arith.addf %97, %101 : vector<24x1xf32>
    %c0_72 = arith.constant 0 : index
    %c0_73 = arith.constant 0 : index
    %103 = vector.load %arg19[%c0_72, %c0_73] : memref<24x1xf32, #tpu.memory_space<vmem>>, vector<24x1xf32>
    tpu.vector_store %arg19[%c0_72, %c0_73], %102 {strides = array<i32>} : memref<24x1xf32, #tpu.memory_space<vmem>>, vector<24x1xf32>,
    %c0_74 = arith.constant 0 : index
    %c0_75 = arith.constant 0 : index
    %104 = vector.load %arg15[%c0_74, %c0_75] : memref<24x1xf32, #tpu.memory_space<vmem>>, vector<24x1xf32>
    tpu.vector_store %arg15[%c0_74, %c0_75], %84 {strides = array<i32>} : memref<24x1xf32, #tpu.memory_space<vmem>>, vector<24x1xf32>,
    %c0_76 = arith.constant 0 : index
    %c0_77 = arith.constant 0 : index
    %105 = vector.load %arg17[%c0_76, %c0_77] : memref<24x1xf32, #tpu.memory_space<vmem>>, vector<24x1xf32>
    %cst_78 = arith.constant dense<0xFF800000> : vector<24xf32>
    %106 = vector.multi_reduction <maximumf>, %20, %cst_78 [1] : vector<24x256xf32> to vector<24xf32>
    %107 = vector.shape_cast %106 : vector<24xf32> to vector<24x1xf32>
    %108 = arith.maximumf %105, %107 : vector<24x1xf32>
    %c0_79 = arith.constant 0 : index
    %c0_80 = arith.constant 0 : index
    %109 = vector.load %arg18[%c0_79, %c0_80] : memref<24x1xf32, #tpu.memory_space<vmem>>, vector<24x1xf32>
    %110 = arith.subf %105, %108 : vector<24x1xf32>
    %111 = math.exp %110 : vector<24x1xf32>
    %112 = arith.mulf %109, %111 : vector<24x1xf32>
    %113 = vector.broadcast %108 : vector<24x1xf32> to vector<24x256xf32>
    %114 = arith.subf %20, %113 : vector<24x256xf32>
    %115 = math.exp %114 : vector<24x256xf32>
    %cst_81 = arith.constant dense<0.000000e+00> : vector<24xf32>
    %116 = vector.multi_reduction <add>, %115, %cst_81 [1] : vector<24x256xf32> to vector<24xf32>
    %117 = vector.shape_cast %116 : vector<24xf32> to vector<24x1xf32>
    %118 = arith.addf %112, %117 : vector<24x1xf32>
    %c0_82 = arith.constant 0 : index
    %c0_83 = arith.constant 0 : index
    %119 = vector.load %arg18[%c0_82, %c0_83] : memref<24x1xf32, #tpu.memory_space<vmem>>, vector<24x1xf32>
    tpu.vector_store %arg18[%c0_82, %c0_83], %118 {strides = array<i32>} : memref<24x1xf32, #tpu.memory_space<vmem>>, vector<24x1xf32>,
    %c0_84 = arith.constant 0 : index
    %c0_85 = arith.constant 0 : index
    %120 = vector.load %arg17[%c0_84, %c0_85] : memref<24x1xf32, #tpu.memory_space<vmem>>, vector<24x1xf32>
    tpu.vector_store %arg17[%c0_84, %c0_85], %108 {strides = array<i32>} : memref<24x1xf32, #tpu.memory_space<vmem>>, vector<24x1xf32>,
    %c0_i32_86 = arith.constant 0 : i32
    %121 = arith.cmpi eq, %arg1, %c0_i32_86 : i32
    %122 = arith.extui %121 : i1 to i32
    %c0_i32_87 = arith.constant 0 : i32
    %123 = arith.cmpi ne, %122, %c0_i32_87 : i32
    scf.if %123 {
      %c0_88 = arith.constant 0 : index
      %c0_89 = arith.constant 0 : index
      %124 = vector.load %arg11[%c0_88, %c0_89] : memref<24x1xf32, #tpu.memory_space<vmem>>, vector<24x1xf32>
      %125 = math.log %124 : vector<24x1xf32>
      %c0_90 = arith.constant 0 : index
      %c0_91 = arith.constant 0 : index
      %126 = vector.load %arg10[%c0_90, %c0_91] : memref<24x1xf32, #tpu.memory_space<vmem>>, vector<24x1xf32>
      %127 = arith.addf %125, %126 : vector<24x1xf32>
      %c0_92 = arith.constant 0 : index
      %c0_93 = arith.constant 0 : index
      %128 = vector.load %arg13[%c0_92, %c0_93] : memref<24x1xf32, #tpu.memory_space<vmem>>, vector<24x1xf32>
      %129 = arith.subf %128, %127 : vector<24x1xf32>
      %c0_94 = arith.constant 0 : index
      %c0_95 = arith.constant 0 : index
      %130 = vector.load %arg12[%c0_94, %c0_95] : memref<24x1xf32, #tpu.memory_space<vmem>>, vector<24x1xf32>
      %cst_96 = arith.constant 3.906250e-03 : f32
      %131 = vector.broadcast %cst_96 : f32 to vector<24x1xf32>
      %132 = arith.mulf %130, %131 : vector<24x1xf32>
      %133 = arith.subf %132, %127 : vector<24x1xf32>
      %cst_97 = arith.constant 0.899999976 : f32
      %134 = vector.broadcast %cst_97 : f32 to vector<24x1xf32>
      %135 = arith.mulf %134, %129 : vector<24x1xf32>
      %cst_98 = arith.constant 1.000000e-01 : f32
      %136 = vector.broadcast %cst_98 : f32 to vector<24x1xf32>
      %137 = arith.mulf %136, %133 : vector<24x1xf32>
      %138 = arith.addf %135, %137 : vector<24x1xf32>
      %cst_99 = arith.constant 0.000000e+00 : f32
      %139 = vector.broadcast %cst_99 : f32 to vector<24x1xf32>
      %140 = arith.subf %139, %138 : vector<24x1xf32>
      %c0_100 = arith.constant 0 : index
      %c0_101 = arith.constant 0 : index
      %141 = vector.load %arg7[%c0_100, %c0_101] : memref<24x1xf32, #tpu.memory_space<vmem>>, vector<24x1xf32>
      tpu.vector_store %arg7[%c0_100, %c0_101], %140 {strides = array<i32>} : memref<24x1xf32, #tpu.memory_space<vmem>>, vector<24x1xf32>,
      %c0_102 = arith.constant 0 : index
      %c0_103 = arith.constant 0 : index
      %142 = vector.load %arg14[%c0_102, %c0_103] : memref<24x1xi32, #tpu.memory_space<vmem>>, vector<24x1xi32>
      %c0_104 = arith.constant 0 : index
      %c0_105 = arith.constant 0 : index
      %143 = vector.load %arg8[%c0_104, %c0_105] : memref<24x1xi32, #tpu.memory_space<vmem>>, vector<24x1xi32>
      tpu.vector_store %arg8[%c0_104, %c0_105], %142 {strides = array<i32>} : memref<24x1xi32, #tpu.memory_space<vmem>>, vector<24x1xi32>,
      %c0_106 = arith.constant 0 : index
      %c0_107 = arith.constant 0 : index
      %144 = vector.load %arg16[%c0_106, %c0_107] : memref<24x1xf32, #tpu.memory_space<vmem>>, vector<24x1xf32>
      %145 = math.log %144 : vector<24x1xf32>
      %c0_108 = arith.constant 0 : index
      %c0_109 = arith.constant 0 : index
      %146 = vector.load %arg15[%c0_108, %c0_109] : memref<24x1xf32, #tpu.memory_space<vmem>>, vector<24x1xf32>
      %147 = arith.addf %145, %146 : vector<24x1xf32>
      %c0_110 = arith.constant 0 : index
      %c0_111 = arith.constant 0 : index
      %148 = vector.load %arg18[%c0_110, %c0_111] : memref<24x1xf32, #tpu.memory_space<vmem>>, vector<24x1xf32>
      %149 = math.log %148 : vector<24x1xf32>
      %c0_112 = arith.constant 0 : index
      %c0_113 = arith.constant 0 : index
      %150 = vector.load %arg17[%c0_112, %c0_113] : memref<24x1xf32, #tpu.memory_space<vmem>>, vector<24x1xf32>
      %151 = arith.addf %149, %150 : vector<24x1xf32>
      %c0_114 = arith.constant 0 : index
      %c0_115 = arith.constant 0 : index
      %152 = vector.load %arg19[%c0_114, %c0_115] : memref<24x1xf32, #tpu.memory_space<vmem>>, vector<24x1xf32>
      %c0_116 = arith.constant 0 : index
      %c0_117 = arith.constant 0 : index
      %153 = vector.load %arg16[%c0_116, %c0_117] : memref<24x1xf32, #tpu.memory_space<vmem>>, vector<24x1xf32>
      %154 = arith.divf %152, %153 : vector<24x1xf32>
      %155 = arith.subf %154, %147 : vector<24x1xf32>
      %156 = arith.addf %155, %151 : vector<24x1xf32>
      %c0_118 = arith.constant 0 : index
      %c0_119 = arith.constant 0 : index
      %157 = vector.load %arg9[%c0_118, %c0_119] : memref<24x1xf32, #tpu.memory_space<vmem>>, vector<24x1xf32>
      tpu.vector_store %arg9[%c0_118, %c0_119], %156 {strides = array<i32>} : memref<24x1xf32, #tpu.memory_space<vmem>>, vector<24x1xf32>,
    } else {
    }
    return
  }
  func.func @transform_0(%arg0: i32, %arg1: i32) -> (i32, i32, i32) {
    %c0_i32 = arith.constant 0 : i32
    %c0_i32_0 = arith.constant 0 : i32
    %c0_i32_1 = arith.constant 0 : i32
    return %c0_i32, %arg0, %c0_i32_0 : i32, i32, i32
  }
  func.func @transform_1(%arg0: i32, %arg1: i32) -> (i32, i32, i32) {
    %c0_i32 = arith.constant 0 : i32
    %c0_i32_0 = arith.constant 0 : i32
    %c0_i32_1 = arith.constant 0 : i32
    return %c0_i32, %c0_i32_0, %arg1 : i32, i32, i32
  }
  func.func @transform_2(%arg0: i32, %arg1: i32) -> (i32, i32, i32) {
    %c0_i32 = arith.constant 0 : i32
    %c0_i32_0 = arith.constant 0 : i32
    %c0_i32_1 = arith.constant 0 : i32
    return %c0_i32, %c0_i32_0, %arg1 : i32, i32, i32
  }
  func.func @transform_3(%arg0: i32, %arg1: i32) -> (i32, i32) {
    %c0_i32 = arith.constant 0 : i32
    %c0_i32_0 = arith.constant 0 : i32
    return %arg0, %c0_i32 : i32, i32
  }
  func.func @transform_4(%arg0: i32, %arg1: i32) -> (i32, i32, i32) {
    %c0_i32 = arith.constant 0 : i32
    %c0_i32_0 = arith.constant 0 : i32
    return %c0_i32, %arg0, %arg1 : i32, i32, i32
  }
  func.func @transform_5(%arg0: i32, %arg1: i32) -> (i32, i32) {
    %c0_i32 = arith.constant 0 : i32
    %c0_i32_0 = arith.constant 0 : i32
    return %arg0, %c0_i32 : i32, i32
  }
  func.func @transform_6(%arg0: i32, %arg1: i32) -> (i32, i32) {
    %c0_i32 = arith.constant 0 : i32
    %c0_i32_0 = arith.constant 0 : i32
    return %arg0, %c0_i32 : i32, i32
  }
  func.func @transform_7(%arg0: i32, %arg1: i32) -> (i32, i32) {
    %c0_i32 = arith.constant 0 : i32
    %c0_i32_0 = arith.constant 0 : i32
    return %arg0, %c0_i32 : i32, i32
  }
}

</mosaic_0001>

<bundles_post_ra>
// kernel: squeeze.9
= control target key start
LH: loop header
LB: loop body
LE: loop exit
PB: predicated region body
PF: predicated region fallthrough
CT: control target
= control target key end

     0   :  { %vm7_vm0 = vcmask 72704   ;;  %s39_s0 = inlined_call_operand.vmem [shape: f32[18], index: 0, kind: input, shape index: {}]   ;;  %s40_s1 = inlined_call_operand.vmem [shape: f32[2,9], index: 1, kind: output, shape index: {}]  }
   0x1   :  { %v4_v0 = vld [vmem:[%s39_s0] sm:$0x1]  ;;  %s22_s0 = smov 119  }
   0x2   :  { %5 = vst [vmem:[#allocation1] sm:$0x1] %v4_v0 }
   0x9   :  { %v9_v1 = vld [vmem:[#allocation1] sm:$0x1]  }
   0xa   :  { %v6_v2 = vld [vmem:[#allocation1] sm:$0x1]   ;;  %10 = vrot.lane.b32.xlu0 %v9_v1, %s22_s0 }
   0xb   :  { %8 = vst.msk [vmem:[#allocation0] sm:$0x1] %vm7_vm0, %v6_v2  }
  0x7c   :  { %v11_v3 = vpop.permute.xlu0 %10  }
  0x7d   :  { %14 = vst.msk [vmem:[#allocation0 + $0x1] sm:$0x1] %vm7_vm0, %v11_v3  }
  0x84   :  { %v18_v4 = vld [vmem:[#allocation0] sm:$0x3] }
  0x85   :  { %20 = vst [vmem:[%s40_s1] sm:$0x3] %v18_v4 }

// kernel: squeeze.8
= control target key start
LH: loop header
LB: loop body
LE: loop exit
PB: predicated region body
PF: predicated region fallthrough
CT: control target
= control target key end

     0   :  { %vm7_vm0 = vcmask 72704   ;;  %s39_s0 = inlined_call_operand.vmem [shape: s32[18], index: 0, kind: input, shape index: {}]   ;;  %s40_s1 = inlined_call_operand.vmem [shape: s32[2,9], index: 1, kind: output, shape index: {}]  }
   0x1   :  { %v4_v0 = vld [vmem:[%s39_s0] sm:$0x1]  ;;  %s22_s0 = smov 119  }
   0x2   :  { %5 = vst [vmem:[#allocation1] sm:$0x1] %v4_v0 }
   0x9   :  { %v9_v1 = vld [vmem:[#allocation1] sm:$0x1]  }
   0xa   :  { %v6_v2 = vld [vmem:[#allocation1] sm:$0x1]   ;;  %10 = vrot.lane.b32.xlu0 %v9_v1, %s22_s0 }
   0xb   :  { %8 = vst.msk [vmem:[#allocation0] sm:$0x1] %vm7_vm0, %v6_v2  }
  0x7c   :  { %v11_v3 = vpop.permute.xlu0 %10  }
  0x7d   :  { %14 = vst.msk [vmem:[#allocation0 + $0x1] sm:$0x1] %vm7_vm0, %v11_v3  }
  0x84   :  { %v18_v4 = vld [vmem:[#allocation0] sm:$0x3] }
  0x85   :  { %20 = vst [vmem:[%s40_s1] sm:$0x3] %v18_v4 }

// kernel: squeeze.5
= control target key start
LH: loop header
LB: loop body
LE: loop exit
PB: predicated region body
PF: predicated region fallthrough
CT: control target
= control target key end

     0   :  { %s92_s0 = inlined_call_operand.vmem [shape: f32[1,18,256], index: 0, kind: input, shape index: {}]   ;;  %s93_s1 = inlined_call_operand.vmem [shape: f32[2,9,256], index: 1, kind: output, shape index: {}]  }
   0x1   :  { %v2_v0 = vld [vmem:[%s92_s0] sm:$0xff]   ;;  %v28_v1 = vld [vmem:[%s92_s0 + $0x8] sm:$0xff]   ;;  %v30_v2 = vld [vmem:[%s92_s0 + $0x10] sm:$0xff]  }
   0x2   :  { %3 = vst [vmem:[%s93_s1] sm:$0xff] %v2_v0   ;;  %29 = vst [vmem:[%s93_s1 + $0x8] sm:$0xff] %v28_v1   ;;  %v33_v3 = vld [vmem:[%s92_s0 + $0x18] sm:$0xff]   ;;  %v36_v4 = vld [vmem:[%s92_s0 + $0x20] sm:$0x3]  }
   0x3   :  { %31 = vst [vmem:[%s93_s1 + $0x10] ss:$16 sm:$0x3] %v30_v2   ;;  %32 = vst [vmem:[%s93_s1 + $0x1f] sm:$0xfc] %v30_v2  }
   0x4   :  { %v38_v5 = vld [vmem:[%s92_s0 + $0x28] sm:$0x3]   ;;  %34 = vst [vmem:[%s93_s1 + $0x18] ss:$16 sm:$0x3] %v33_v3  }
   0x5   :  { %35 = vst [vmem:[%s93_s1 + $0x27] sm:$0xfc] %v33_v3   ;;  %37 = vst [vmem:[%s93_s1 + $0x27] ss:$9 sm:$0x3] %v36_v4  }
   0x6   :  { %39 = vst [vmem:[%s93_s1 + $0x2f] ss:$9 sm:$0x3] %v38_v5  }

// kernel: generator_train_forward.1
= control target key start
LH: loop header
LB: loop body
LE: loop exit
PB: predicated region body
PF: predicated region fallthrough
CT: control target
= control target key end

     0   :  { %v1080_v1 = vmov 0   ;;  %vm104_vm0 = vcmask 261120   ;;  %vm26_vm1 = vcmask 7168   ;;  %v1081_v19 = vmov -inf   ;;  %s1656_s1 = inlined_call_operand.vmem [shape: bf16[3,32,256], index: 1, kind: input, shape index: {}]   ;;  %s1657_s0 = inlined_call_operand.vmem [shape: bf16[3,24,32], index: 0, kind: input, shape index: {}]   ;;  %s1658_s2 = inlined_call_operand.vmem [shape: f32[3,1,256], index: 2, kind: input, shape index: {}]   ;;  %s1659_s4 = inlined_call_operand.vmem [shape: f32[2,24,256], index: 4, kind: output, shape index: {0}]   ;;  %s1660_s3 = inlined_call_operand.vmem [shape: s32[24,1], index: 3, kind: input, shape index: {}]   ;;  %s1661_s5 = inlined_call_operand.vmem [shape: f32[24,1], index: 5, kind: output, shape index: {1}]   ;;  %s1662_s7 = inlined_call_operand.vmem [shape: f32[24,1], index: 7, kind: output, shape index: {3}]   ;;  %s1663_s6 = inlined_call_operand.vmem [shape: s32[24,1], index: 6, kind: output, shape index: {2}]  }
   0x1   :  { %v978_v0 = vld [vmem:[%s1656_s1 + $0x4] ss:$8 sps:$4 sm:$0xff]   ;;  %143 = vmatprep.mubr.bf16.mxu0 %v1080_v1  ;;  %153 = vmatprep.mubr.bf16.mxu1 %v1080_v1  ;;  %v980_v2 = vld [vmem:[%s1656_s1] ss:$8 sps:$4 sm:$0xff]   ;;  %v981_v3 = vld [vmem:[%s1656_s1 + $0x14] ss:$8 sps:$4 sm:$0xff]   ;;  %v66_v20 = vlaneseq }
   0x2   :  { %976 = vset.pattern.permute.xlu1 %v1080_v1  ;;  %977 = vset.pattern.permute.xlu0 %v1080_v1  ;;  %v983_v4 = vld [vmem:[%s1656_s1 + $0x10] ss:$8 sps:$4 sm:$0xff]   ;;  %v984_v5 = vld [vmem:[%s1657_s0] sm:$0xff]   ;;  %v985_v7 = vld [vmem:[%s1657_s0 + $0x8] ss:$0 sps:$4 sm:$0xff]   ;;  %29 = vst.msk [vmem:[#allocation2 + $0x10] sm:$0xff] %vm26_vm1, %v1081_v19 }
   0x3   :  { %111 = vmatprep.subr.bf16.mxu0 %v978_v0  ;;  %969 = vmatprep.subr.bf16.mxu1 %v978_v0  ;;  %v988_v6 = vld [vmem:[%s1656_s1 + $0x24] ss:$8 sps:$4 sm:$0xff]   ;;  %v986_v8 = vld [vmem:[%s1656_s1 + $0x20] ss:$8 sps:$4 sm:$0xff]   ;;  %v991_v9 = vld [vmem:[%s1656_s1 + $0x34] ss:$8 sps:$4 sm:$0xff]  }
   0x4   :  { %112 = vmatpush1.bf16.msra.mxu0 %v980_v2  ;;  %971 = vmatpush1.bf16.msra.mxu1 %v980_v2  ;;  %v993_v10 = vld [vmem:[%s1656_s1 + $0x40] ss:$8 sps:$4 sm:$0xff]   ;;  %v995_v11 = vld [vmem:[%s1656_s1 + $0x44] ss:$8 sps:$4 sm:$0xff]   ;;  %v998_v12 = vld [vmem:[%s1656_s1 + $0x54] ss:$8 sps:$4 sm:$0xff]  }
   0x5   :  { %113 = vmatprep.subr.bf16.mxu0 %v981_v3  ;;  %970 = vmatprep.subr.bf16.mxu1 %v981_v3  ;;  %v989_v13 = vld [vmem:[%s1656_s1 + $0x30] ss:$8 sps:$4 sm:$0xff]   ;;  %v1001_v17 = vld [vmem:[%s1657_s0 + $0x14] ss:$0 sps:$4 sm:$0xff]   ;;  %v1000_v18 = vld [vmem:[%s1657_s0 + $0x20] ss:$0 sps:$4 sm:$0xff]  }
   0x6   :  { %v996_v14 = vld [vmem:[%s1656_s1 + $0x50] ss:$8 sps:$4 sm:$0xff]   ;;  %27 = vst.msk [vmem:[#allocation2] sm:$0xff] %vm26_vm1, %v1081_v19  ;;  %28 = vst.msk [vmem:[#allocation2 + $0x8] sm:$0xff] %vm26_vm1, %v1081_v19  ;;  %v67_v21 = vshrl.u32 %v66_v20, 7 }
   0x7   :  { %v992_v15 = vld [vmem:[%s1657_s0 + $0xc] sm:$0xff]   ;;  %v999_v16 = vld [vmem:[%s1657_s0 + $0x18] sm:$0xff]   ;;  %39 = vst.msk [vmem:[#allocation6] sm:$0xff] %vm26_vm1, %v1080_v1  ;;  %40 = vst.msk [vmem:[#allocation6 + $0x8] sm:$0xff] %vm26_vm1, %v1080_v1 }
   0x8   :  { %114 = vmatpush1.bf16.msra.mxu0 %v983_v4  ;;  %972 = vmatpush1.bf16.msra.mxu1 %v983_v4  ;;  %41 = vst.msk [vmem:[#allocation6 + $0x10] sm:$0xff] %vm26_vm1, %v1080_v1  ;;  %42 = vst.msk [vmem:[#allocation7] sm:$0xff] %vm26_vm1, %v1081_v19  ;;  %v68_v22 = vsub.s32 0, %v67_v21  ;;  %v64_v23 = vld [vmem:[%s1658_s2] sm:$0x3]  ;;  %v72_v24 = vsub.s32 1, %v67_v21 }
   0x9   :  { %218 = vmatprep.subr.bf16.mxu1 %v988_v6  ;;  %325 = vmatprep.subr.bf16.mxu0 %v995_v11  ;;  %43 = vst.msk [vmem:[#allocation7 + $0x8] sm:$0xff] %vm26_vm1, %v1081_v19  ;;  %44 = vst.msk [vmem:[#allocation7 + $0x10] sm:$0xff] %vm26_vm1, %v1081_v19  ;;  %v938_v37 = vld [vmem:[%s1658_s2 + $0x2] sm:$0x3]  ;;  %v954_v44 = vld [vmem:[%s1658_s2 + $0x4] sm:$0x3] }
   0xa   :  { %48 = vst.msk [vmem:[#allocation9] sm:$0xff] %vm26_vm1, %v1081_v19  ;;  %49 = vst.msk [vmem:[#allocation9 + $0x8] sm:$0xff] %vm26_vm1, %v1081_v19  ;;  %v69_v25 = vrot.slane %v64_v23, %v68_v22  ;;  %v73_v26 = vrot.slane %v64_v23, %v72_v24  ;;  %v177_v45 = vrot.slane %v938_v37, %v68_v22  ;;  %v1082_v21 = vmov 0.0   ;;  %v1328_v23 = vld [vmem:[#allocation2 + $0x10] sm:$0xff] }
   0xb   :  { %929 = vmatmul.mubr.msk.bf16.vlgmr.msra.gmra.mrb[0].mxu0 %vm104_vm0, %v984_v5  ;;  %930 = vmatmul.mubr.msk.bf16.vlgmr.msra.gmra.mrb[0].mxu1 %vm104_vm0, %v985_v7  ;;  %50 = vst.msk [vmem:[#allocation9 + $0x10] sm:$0xff] %vm26_vm1, %v1081_v19  ;;  %v181_v46 = vrot.slane %v938_v37, %v72_v24  ;;  %v284_v47 = vrot.slane %v954_v44, %v68_v22  ;;  %34 = vst.msk [vmem:[#allocation4 + $0x8] sm:$0xff] %vm26_vm1, %v1082_v21  ;;  %v1326_v22 = vand.u32 127, %v66_v20 }
   0xc   :  { %219 = vmatpush1.bf16.msra.mxu1 %v986_v8  ;;  %250 = vmatprep.mubr.bf16.mxu1 %v1080_v1  ;;  %v288_v50 = vrot.slane %v954_v44, %v72_v24  ;;  %30 = vst.msk [vmem:[#allocation3] sm:$0xff] %vm26_vm1, %v1082_v21  ;;  %31 = vst.msk [vmem:[#allocation3 + $0x8] sm:$0xff] %vm26_vm1, %v1082_v21 }
   0xd   :  { %220 = vmatprep.subr.bf16.mxu1 %v991_v9  ;;  %326 = vmatpush1.bf16.msra.mxu0 %v993_v10  ;;  %32 = vst.msk [vmem:[#allocation3 + $0x10] sm:$0xff] %vm26_vm1, %v1082_v21  ;;  %33 = vst.msk [vmem:[#allocation4] sm:$0xff] %vm26_vm1, %v1082_v21  ;;  %v1330_v24 = vld [vmem:[#allocation2] sm:$0xff] }
   0xe   :  { %357 = vmatprep.mubr.bf16.mxu0 %v1080_v1  ;;  %327 = vmatprep.subr.bf16.mxu0 %v998_v12  ;;  %35 = vst.msk [vmem:[#allocation4 + $0x10] sm:$0xff] %vm26_vm1, %v1082_v21  ;;  %36 = vst.msk [vmem:[#allocation5] sm:$0xff] %vm26_vm1, %v1082_v21 }
   0xf   :  { %37 = vst.msk [vmem:[#allocation5 + $0x8] sm:$0xff] %vm26_vm1, %v1082_v21  ;;  %38 = vst.msk [vmem:[#allocation5 + $0x10] sm:$0xff] %vm26_vm1, %v1082_v21 }
  0x10   :  { %221 = vmatpush1.bf16.msra.mxu1 %v989_v13  ;;  %45 = vst.msk [vmem:[#allocation8] sm:$0xff] %vm26_vm1, %v1082_v21  ;;  %46 = vst.msk [vmem:[#allocation8 + $0x8] sm:$0xff] %vm26_vm1, %v1082_v21 }
  0x11   :  { %328 = vmatpush1.bf16.msra.mxu0 %v996_v14  ;;  %47 = vst.msk [vmem:[#allocation8 + $0x10] sm:$0xff] %vm26_vm1, %v1082_v21  ;;  %51 = vst.msk [vmem:[#allocation10] sm:$0xff] %vm26_vm1, %v1082_v21 }
  0x12   :  { %52 = vst.msk [vmem:[#allocation10 + $0x8] sm:$0xff] %vm26_vm1, %v1082_v21  ;;  %53 = vst.msk [vmem:[#allocation10 + $0x10] sm:$0xff] %vm26_vm1, %v1082_v21 }
  0x13   :  { %945 = vmatmul.mubr.msk.bf16.vlgmr.msra.gmra.mrb[4].mxu1 %vm104_vm0, %v992_v15  ;;  %54 = vst.msk [vmem:[#allocation11] sm:$0xff] %vm26_vm1, %v1082_v21  ;;  %55 = vst.msk [vmem:[#allocation11 + $0x8] sm:$0xff] %vm26_vm1, %v1082_v21 }
  0x14   :  { %260 = vmatprep.mubr.bf16.mxu1 %v1080_v1  ;;  %961 = vmatmul.mubr.msk.bf16.vlgmr.msra.gmra.mrb[4].mxu0 %vm104_vm0, %v999_v16  ;;  %56 = vst.msk [vmem:[#allocation11 + $0x10] sm:$0xff] %vm26_vm1, %v1082_v21 }
  0x15   :  { %367 = vmatprep.mubr.bf16.mxu0 %v1080_v1 }
  0x1b   :  { %946 = vmatmul.mubr.msk.bf16.gmra.mrb[8].mxu1 %vm104_vm0, %v1001_v17 }
  0x1c   :  { %962 = vmatmul.mubr.msk.bf16.gmra.mrb[8].mxu0 %vm104_vm0, %v1000_v18 }
  0xde   :  { %v145_v27 = vpop.f32.mrb[0].mxu0  ;;  %v155_v28 = vpop.f32.mrb[0].mxu1 }
  0xdf   :  { %v1199_v29 = vadd.f32 %v145_v27, %v69_v25  ;;  %v1201_v30 = vadd.f32 %v155_v28, %v69_v25  ;;  %v147_v31 = vpop.f32.mrb[1].mxu0  ;;  %v157_v32 = vpop.f32.mrb[1].mxu1  ;;  %v1351_v28 = vld [vmem:[#allocation2 + $0x8] sm:$0xff] }
  0xe0   :  { %v1203_v33 = vadd.f32 %v147_v31, %v73_v26  ;;  %v1205_v34 = vadd.f32 %v157_v32, %v73_v26  ;;  %v149_v35 = vpop.f32.mrb[2].mxu0  ;;  %v159_v36 = vpop.f32.mrb[2].mxu1 }
  0xe1   :  { %376 = vst [vmem:[%s1659_s4] sm:$0xff] %v1199_v29  ;;  %380 = vst [vmem:[%s1659_s4 + $0x20] sm:$0xff] %v1201_v30  ;;  %v1218_v38 = vadd.f32 %v149_v35, %v69_v25  ;;  %v151_v39 = vpop.f32.mrb[3].mxu0  ;;  %v160_v40 = vpop.f32.mrb[3].mxu1  ;;  %v1333_v25 = vadd.s32 128, %v1326_v22 }
  0xe2   :  { %377 = vst [vmem:[%s1659_s4 + $0x8] sm:$0xff] %v1203_v33  ;;  %381 = vst [vmem:[%s1659_s4 + $0x28] sm:$0xff] %v1205_v34  ;;  %v1228_v41 = vadd.f32 %v151_v39, %v73_v26  ;;  %v408_v42 = vmax.f32 %v1201_v30, %v1205_v34  ;;  %v402_v43 = vmax.f32 %v1199_v29, %v1203_v33 }
  0xe3   :  { %378 = vst [vmem:[%s1659_s4 + $0x10] sm:$0xff] %v1218_v38 }
  0xe4   :  { %379 = vst [vmem:[%s1659_s4 + $0x18] sm:$0xff] %v1228_v41  ;;  %409 = vmax.xlane.f32.xlu1 %v408_v42  ;;  %403 = vmax.xlane.f32.xlu0 %v402_v43  ;;  %v405_v49 = vmax.f32 %v1218_v38, %v1228_v41  ;;  %v1374_v42 = vld [vmem:[#allocation9] sm:$0xff] }
  0xe6   :  { %v252_v48 = vpop.f32.mrb[4].mxu1 }
  0xe7   :  { %v1247_v51 = vadd.f32 %v252_v48, %v177_v45  ;;  %v254_v52 = vpop.f32.mrb[5].mxu1  ;;  %v359_v54 = vpop.f32.mrb[4].mxu0 }
  0xe8   :  { %v1249_v53 = vadd.f32 %v254_v52, %v181_v46  ;;  %406 = vmax.xlane.f32.xlu0 %v405_v49  ;;  %v256_v55 = vpop.f32.mrb[6].mxu1  ;;  %v1255_v56 = vadd.f32 %v359_v54, %v284_v47  ;;  %v361_v57 = vpop.f32.mrb[5].mxu0  ;;  %v1394_v52 = vld [vmem:[#allocation7 + $0x8] sm:$0xff] }
  0xe9   :  { %963 = vst [vmem:[%s1659_s4 + $0x30] sm:$0xff] %v1247_v51  ;;  %v1257_v58 = vadd.f32 %v256_v55, %v177_v45  ;;  %v258_v59 = vpop.f32.mrb[7].mxu1  ;;  %v1265_v61 = vadd.f32 %v361_v57, %v288_v50  ;;  %v363_v62 = vpop.f32.mrb[6].mxu0 }
  0xea   :  { %964 = vst [vmem:[%s1659_s4 + $0x38] sm:$0xff] %v1249_v53  ;;  %v727_v60 = vmax.f32 %v1247_v51, %v1249_v53  ;;  %v1267_v63 = vadd.f32 %v258_v59, %v181_v46  ;;  %v1273_v0 = vadd.f32 %v363_v62, %v284_v47  ;;  %v365_v1 = vpop.f32.mrb[7].mxu0  ;;  %v398_v59 = vld [vmem:[%s1660_s3 + $0x10] sm:$0xff] }
  0xeb   :  { %965 = vst [vmem:[%s1659_s4 + $0x40] sm:$0xff] %v1257_v58  ;;  %v1279_v2 = vadd.f32 %v365_v1, %v288_v50  ;;  %v613_v3 = vmax.f32 %v1255_v56, %v1265_v61  ;;  %v1414_v1 = vld [vmem:[#allocation9 + $0x10] sm:$0xff] }
  0xec   :  { %728 = vmax.xlane.f32.xlu0 %v727_v60  ;;  %966 = vst [vmem:[%s1659_s4 + $0x48] sm:$0xff] %v1267_v63  ;;  %v730_v19 = vmax.f32 %v1257_v58, %v1267_v63 }
  0xed   :  { %614 = vmax.xlane.f32.xlu1 %v613_v3  ;;  %v616_v4 = vmax.f32 %v1273_v0, %v1279_v2 }
  0xee   :  { %v262_v5 = vpop.f32.mrb[8].mxu1 }
  0xef   :  { %v1285_v6 = vadd.f32 %v262_v5, %v177_v45  ;;  %v264_v7 = vpop.f32.mrb[9].mxu1  ;;  %v369_v8 = vpop.f32.mrb[8].mxu0 }
  0xf0   :  { %617 = vmax.xlane.f32.xlu0 %v616_v4  ;;  %v1287_v9 = vadd.f32 %v264_v7, %v181_v46  ;;  %v266_v10 = vpop.f32.mrb[10].mxu1  ;;  %v1289_v11 = vadd.f32 %v369_v8, %v284_v47  ;;  %v371_v12 = vpop.f32.mrb[9].mxu0  ;;  %v1384_v47 = vld [vmem:[#allocation7] sm:$0xff]  ;;  %v1420_v4 = vld [vmem:[#allocation7 + $0x10] sm:$0xff] }
  0xf1   :  { %967 = vst [vmem:[%s1659_s4 + $0x50] sm:$0xff] %v1285_v6  ;;  %v267_v13 = vpop.f32.mrb[11].mxu1  ;;  %v1295_v14 = vadd.f32 %v371_v12, %v288_v50  ;;  %v373_v15 = vpop.f32.mrb[10].mxu0 }
  0xf2   :  { %968 = vst [vmem:[%s1659_s4 + $0x58] sm:$0xff] %v1287_v9  ;;  %v733_v16 = vmax.f32 %v1285_v6, %v1287_v9  ;;  %v374_v17 = vpop.f32.mrb[11].mxu0  ;;  %v1432_v13 = vld [vmem:[#allocation9 + $0x8] sm:$0xff] }
  0xf3   :  { %v619_v18 = vmax.f32 %v1289_v11, %v1295_v14 }
  0xf4   :  { %734 = vmax.xlane.f32.xlu0 %v733_v16 }
  0xf5   :  { %620 = vmax.xlane.f32.xlu1 %v619_v18 }
  0xf9   :  { %731 = vmax.xlane.f32.xlu1 %v730_v19  ;;  %v396_v19 = vld [vmem:[%s1660_s3] sm:$0xff] }
 0x171   :  { %v1335_v26 = vpop.xlane.xlu1 %409  ;;  %v1337_v27 = vpop.xlane.xlu0 %403 }
 0x172   :  { %1668 = vst [vmem:[#allocation12_spill] sm:$0xff] %v1335_v26  ;;  %1669 = vst [vmem:[#allocation13_spill] sm:$0xff] %v1337_v27  ;;  %vm597_vm2 = vcmp.gt.f32.partialorder %v1335_v26, %v1328_v23  ;;  %vm535_vm3 = vcmp.ge.f32.partialorder %v1199_v29, %v1337_v27  ;;  %vm536_vm4 = vcmp.ge.f32.partialorder %v1203_v33, %v1337_v27 }
 0x173   :  { %vm595_vm5 = vcmp.gt.f32.partialorder %v1337_v27, %v1330_v24  ;;  %v1349_v20 = vmax.f32 %v1330_v24, %v1337_v27  ;;  %v1355_v31 = vmax.f32 %v1328_v23, %v1335_v26  ;;  %v541_v32 = vsel %vm535_vm3, %v1326_v22, 1073741824 }
 0x174   :  { %v542_v35 = vsel %vm536_vm4, %v1333_v25, 1073741824  ;;  %vm539_vm11 = vcmp.ge.f32.partialorder %v1201_v30, %v1335_v26  ;;  %vm540_vm12 = vcmp.ge.f32.partialorder %v1205_v34, %v1335_v26 }
 0x175   :  { %431 = vperm.xlu1 %976, %v1349_v20   ;;  %607 = vst.msk [vmem:[#allocation2] sm:$0xff] %vm26_vm1, %v1349_v20  ;;  %v1364_v37 = vpop.xlane.xlu0 %406  ;;  %609 = vst.msk [vmem:[#allocation2 + $0x10] sm:$0xff] %vm26_vm1, %v1355_v31  ;;  %vm547_vm6 = vcmp.lt.s32.totalorder %v541_v32, %v542_v35 }
 0x176   :  { %1670 = vst [vmem:[#allocation14_spill] sm:$0xff] %v1364_v37  ;;  %vm596_vm7 = vcmp.gt.f32.partialorder %v1364_v37, %v1351_v28  ;;  %v1372_v40 = vsel %vm547_vm6, %v541_v32, %v542_v35  ;;  %v1379_v44 = vmax.f32 %v1351_v28, %v1364_v37  ;;  %vm537_vm8 = vcmp.ge.f32.partialorder %v1218_v38, %v1364_v37  ;;  %v397_v35 = vld [vmem:[%s1660_s3 + $0x8] sm:$0xff] }
 0x177   :  { %v550_v43 = vshra.s32 %v1372_v40, 16  ;;  %vm538_vm9 = vcmp.ge.f32.partialorder %v1228_v41, %v1364_v37  ;;  %v543_v21 = vsel %vm537_vm8, %v1326_v22, 1073741824 }
 0x178   :  { %608 = vst.msk [vmem:[#allocation2 + $0x8] sm:$0xff] %vm26_vm1, %v1379_v44  ;;  %v544_v32 = vsel %vm538_vm9, %v1333_v25, 1073741824 }
 0x179   :  { %441 = vperm.xlu1 %976, %v1355_v31   ;;  %v729_v45 = vpop.xlane.xlu0 %728  ;;  %v1382_v46 = vcvt.s32.f32 %v550_v43  ;;  %vm563_vm10 = vcmp.lt.s32.totalorder %v543_v21, %v544_v32 }
 0x17a   :  { %v1391_v49 = vmax.f32 %v1374_v42, %v729_v45  ;;  %v615_v50 = vpop.xlane.xlu1 %614  ;;  %v1459_v43 = vsel %vm563_vm10, %v543_v21, %v544_v32  ;;  %v481_v21 = vadd.f32 %v1203_v33, %v1199_v29  ;;  %v487_v32 = vadd.f32 %v1205_v34, %v1201_v30 }
 0x17b   :  { %553 = vmin.xlane.f32.xlu0 %v1382_v46  ;;  %v1401_v55 = vmax.f32 %v1384_v47, %v615_v50  ;;  %v566_v45 = vshra.s32 %v1459_v43, 16 }
 0x17c   :  { %802 = vst.msk [vmem:[#allocation9] sm:$0xff] %vm26_vm1, %v1391_v49 }
 0x17d   :  { %756 = vperm.xlu1 %976, %v1391_v49   ;;  %v618_v57 = vpop.xlane.xlu0 %617  ;;  %721 = vst.msk [vmem:[#allocation7] sm:$0xff] %vm26_vm1, %v1401_v55  ;;  %v1463_v50 = vcvt.s32.f32 %v566_v45 }
 0x17e   :  { %v1412_v62 = vmax.f32 %v1394_v52, %v618_v57  ;;  %v484_v57 = vadd.f32 %v1228_v41, %v1218_v38 }
 0x180   :  { %722 = vst.msk [vmem:[#allocation7 + $0x8] sm:$0xff] %vm26_vm1, %v1412_v62 }
 0x181   :  { %506 = vperm.xlu1 %976, %v398_v59   ;;  %v735_v5 = vpop.xlane.xlu0 %734  ;;  %v545_v59 = vsel %vm539_vm11, %v1326_v22, 1073741824 }
 0x182   :  { %v1423_v7 = vmax.f32 %v1414_v1, %v735_v5  ;;  %v621_v8 = vpop.xlane.xlu1 %620  ;;  %v546_v5 = vsel %vm540_vm12, %v1333_v25, 1073741824 }
 0x183   :  { %v1426_v10 = vmax.f32 %v1420_v4, %v621_v8  ;;  %vm579_vm13 = vcmp.lt.s32.totalorder %v545_v59, %v546_v5 }
 0x184   :  { %1671 = vst [vmem:[#allocation15_spill] sm:$0xff] %v1423_v7  ;;  %804 = vst.msk [vmem:[#allocation9 + $0x10] sm:$0xff] %vm26_vm1, %v1423_v7  ;;  %v1477_v8 = vsel %vm579_vm13, %v545_v59, %v546_v5 }
 0x185   :  { %723 = vst.msk [vmem:[#allocation7 + $0x10] sm:$0xff] %vm26_vm1, %v1426_v10 }
 0x186   :  { %v732_v16 = vpop.xlane.xlu1 %731 }
 0x187   :  { %v1439_v17 = vmax.f32 %v1432_v13, %v732_v16  ;;  %v582_v16 = vshra.s32 %v1477_v8, 16 }
 0x189   :  { %803 = vst.msk [vmem:[#allocation9 + $0x8] sm:$0xff] %vm26_vm1, %v1439_v17 }
 0x191   :  { %436 = vperm.xlu0 %977, %v1379_v44  }
 0x195   :  { %636 = vperm.xlu0 %977, %v1401_v55  }
 0x199   :  { %500 = vperm.xlu0 %977, %v396_v19   ;;  %v1480_v19 = vcvt.s32.f32 %v582_v16 }
 0x19d   :  { %503 = vperm.xlu0 %977, %v397_v35  }
 0x1a1   :  { %641 = vperm.xlu0 %977, %v1412_v62  }
 0x1a5   :  { %569 = vmin.xlane.f32.xlu1 %v1463_v50  ;;  %761 = vperm.xlu0 %977, %v1439_v17  }
 0x1a9   :  { %485 = vadd.xlane.f32.xlu1 %v484_v57  ;;  %646 = vperm.xlu0 %977, %v1426_v10  }
 0x1ad   :  { %766 = vperm.xlu0 %977, %v1423_v7  }
 0x1cc   :  { %585 = vmin.xlane.f32.xlu0 %v1480_v19 }
 0x1d0   :  { %482 = vadd.xlane.f32.xlu0 %v481_v21 }
 0x1d4   :  { %488 = vadd.xlane.f32.xlu0 %v487_v32 }
 0x1f4   :  { %v432_v35 = vpop.permute.xlu1 %431 }
 0x1f5   :  { %v444_v57 = vsub.f32 %v1199_v29, %v432_v35  ;;  %v445_v59 = vsub.f32 %v1203_v33, %v432_v35 }
 0x1f7   :  { %v450_v18 = vmul.f32 1.442695, %v444_v57  ;;  %v452_v3 = vmul.f32 1.442695, %v445_v59 }
 0x1f8   :  { %v442_v45 = vpop.permute.xlu1 %441 }
 0x1f9   :  { %v448_v5 = vsub.f32 %v1201_v30, %v442_v45  ;;  %v449_v16 = vsub.f32 %v1205_v34, %v442_v45  ;;  %1002 = vpow2.f32 %v450_v18 }
 0x1fa   :  { %1004 = vpow2.f32 %v452_v3 }
 0x1fb   :  { %v458_v21 = vmul.f32 1.442695, %v448_v5  ;;  %v460_v60 = vmul.f32 1.442695, %v449_v16 }
 0x1fc   :  { %v757_v12 = vpop.permute.xlu1 %756 }
 0x1fd   :  { %v769_v54 = vsub.f32 %v1247_v51, %v757_v12  ;;  %v770_v32 = vsub.f32 %v1249_v53, %v757_v12  ;;  %1006 = vpow2.f32 %v458_v21 }
 0x1fe   :  { %1008 = vpow2.f32 %v460_v60 }
 0x1ff   :  { %v775_v45 = vmul.f32 1.442695, %v769_v54  ;;  %v777_v57 = vmul.f32 1.442695, %v770_v32 }
 0x208   :  { %v1491_v15 = vpop.xlane.xlu0 %553 }
 0x209   :  { %vm555_vm9 = vcmp.eq.f32.partialorder %v1382_v46, %v1491_v15  ;;  %v480_v46 = vld [vmem:[#allocation4 + $0x10] sm:$0xff] }
 0x210   :  { %v437_v39 = vpop.permute.xlu0 %436 }
 0x211   :  { %v446_v48 = vsub.f32 %v1218_v38, %v437_v39  ;;  %v447_v35 = vsub.f32 %v1228_v41, %v437_v39 }
 0x213   :  { %v454_v36 = vmul.f32 1.442695, %v446_v48  ;;  %v456_v26 = vmul.f32 1.442695, %v447_v35  ;;  %v1003_v48 = vpop.eup %1002 }
 0x214   :  { %v637_v59 = vpop.permute.xlu0 %636  ;;  %v1005_v60 = vpop.eup %1004 }
 0x215   :  { %1010 = vpow2.f32 %v454_v36  ;;  %v649_v5 = vsub.f32 %v1255_v56, %v637_v59  ;;  %v650_v16 = vsub.f32 %v1265_v61, %v637_v59  ;;  %v462_v35 = vadd.f32 %v1005_v60, %v1003_v48 }
 0x216   :  { %1012 = vpow2.f32 %v456_v26  ;;  %v1007_v26 = vpop.eup %1006 }
 0x217   :  { %1014 = vpow2.f32 %v775_v45  ;;  %v655_v12 = vmul.f32 1.442695, %v649_v5  ;;  %v657_v18 = vmul.f32 1.442695, %v650_v16  ;;  %v1009_v21 = vpop.eup %1008 }
 0x218   :  { %1016 = vpow2.f32 %v777_v57  ;;  %v501_v37 = vpop.permute.xlu0 %500 }
 0x219   :  { %1018 = vpow2.f32 %v655_v12  ;;  %vm508_vm14 = vcmp.eq.s32.totalorder %v1326_v22, %v501_v37  ;;  %vm509_vm15 = vcmp.eq.s32.totalorder %v1333_v25, %v501_v37 }
 0x21a   :  { %1020 = vpow2.f32 %v657_v18  ;;  %v514_v39 = vsel %vm508_vm14, %v1199_v29, 0.0  ;;  %v515_v36 = vsel %vm509_vm15, %v1203_v33, 0.0 }
 0x21b   :  { %v520_v54 = vadd.f32 %v515_v36, %v514_v39  ;;  %v468_v39 = vadd.f32 %v1009_v21, %v1007_v26 }
 0x21c   :  { %v1503_v3 = vpop.permute.xlu0 %503 }
 0x21d   :  { %521 = vadd.xlane.f32.xlu1 %v520_v54  ;;  %vm510_vm0 = vcmp.eq.s32.totalorder %v1326_v22, %v1503_v3  ;;  %vm511_vm3 = vcmp.eq.s32.totalorder %v1333_v25, %v1503_v3 }
 0x21e   :  { %v517_v3 = vsel %vm511_vm3, %v1228_v41, 0.0  ;;  %v699_v41 = vsub.f32 %v1295_v14, %v1287_v9 }
 0x21f   :  { %v1011_v32 = vpop.eup %1010 }
 0x220   :  { %v1013_v45 = vpop.eup %1012  ;;  %v642_v57 = vpop.permute.xlu0 %641 }
 0x221   :  { %v1015_v59 = vpop.eup %1014  ;;  %v651_v37 = vsub.f32 %v1273_v0, %v642_v57  ;;  %v652_v5 = vsub.f32 %v1279_v2, %v642_v57  ;;  %463 = vadd.xlane.f32.xlu1 %v462_v35  ;;  %v465_v29 = vadd.f32 %v1013_v45, %v1011_v32 }
 0x222   :  { %v1017_v33 = vpop.eup %1016 }
 0x223   :  { %v1019_v16 = vpop.eup %1018  ;;  %v659_v12 = vmul.f32 1.442695, %v651_v37  ;;  %v661_v18 = vmul.f32 1.442695, %v652_v5  ;;  %466 = vadd.xlane.f32.xlu0 %v465_v29  ;;  %v787_v32 = vadd.f32 %v1017_v33, %v1015_v59 }
 0x224   :  { %v1021_v36 = vpop.eup %1020  ;;  %v762_v54 = vpop.permute.xlu0 %761 }
 0x225   :  { %1022 = vpow2.f32 %v659_v12  ;;  %v771_v48 = vsub.f32 %v1257_v58, %v762_v54  ;;  %v772_v60 = vsub.f32 %v1267_v63, %v762_v54  ;;  %469 = vadd.xlane.f32.xlu1 %v468_v39  ;;  %v673_v27 = vadd.f32 %v1021_v36, %v1019_v16 }
 0x226   :  { %1024 = vpow2.f32 %v661_v18  ;;  %v507_v18 = vpop.permute.xlu1 %506 }
 0x227   :  { %v779_v7 = vmul.f32 1.442695, %v771_v48  ;;  %v781_v57 = vmul.f32 1.442695, %v772_v60  ;;  %674 = vadd.xlane.f32.xlu0 %v673_v27  ;;  %vm512_vm4 = vcmp.eq.s32.totalorder %v1326_v22, %v507_v18  ;;  %vm513_vm6 = vcmp.eq.s32.totalorder %v1333_v25, %v507_v18 }
 0x228   :  { %v647_v35 = vpop.permute.xlu0 %646  ;;  %v696_v22 = vsub.f32 %v1273_v0, %v1257_v58  ;;  %v697_v25 = vsub.f32 %v1279_v2, %v1267_v63  ;;  %v565_v58 = vand.u32 65535, %v1459_v43  ;;  %v549_v63 = vand.u32 65535, %v1372_v40 }
 0x229   :  { %1026 = vpow2.f32 %v779_v7  ;;  %v653_v45 = vsub.f32 %v1289_v11, %v647_v35  ;;  %v654_v26 = vsub.f32 %v1295_v14, %v647_v35  ;;  %788 = vadd.xlane.f32.xlu1 %v787_v32  ;;  %v581_v43 = vand.u32 65535, %v1477_v8 }
 0x22a   :  { %1028 = vpow2.f32 %v781_v57  ;;  %v479_v57 = vld [vmem:[#allocation4 + $0x8] sm:$0xff]  ;;  %v1672_v8 = vsub.f32 %v1330_v24, %v1349_v20 }
 0x22b   :  { %v663_v21 = vmul.f32 1.442695, %v653_v45  ;;  %v665_v37 = vmul.f32 1.442695, %v654_v26  ;;  %v583_v40 = vcvt.s32.f32 %v581_v43 }
 0x22c   :  { %v767_v5 = vpop.permute.xlu0 %766 }
 0x22d   :  { %1030 = vpow2.f32 %v663_v21  ;;  %v773_v29 = vsub.f32 %v1285_v6, %v767_v5  ;;  %v774_v12 = vsub.f32 %v1287_v9, %v767_v5  ;;  %v695_v5 = vsub.f32 %v1265_v61, %v1249_v53 }
 0x22e   :  { %1032 = vpow2.f32 %v665_v37  ;;  %v694_v37 = vsub.f32 %v1255_v56, %v1247_v51  ;;  %v518_v53 = vsel %vm512_vm4, %v1201_v30, 0.0  ;;  %v519_v61 = vsel %vm513_vm6, %v1205_v34, 0.0 }
 0x22f   :  { %v1023_v27 = vpop.eup %1022  ;;  %v783_v59 = vmul.f32 1.442695, %v773_v29  ;;  %v785_v33 = vmul.f32 1.442695, %v774_v12  ;;  %v516_v12 = vsel %vm510_vm0, %v1218_v38, 0.0  ;;  %v698_v38 = vsub.f32 %v1289_v11, %v1285_v6 }
 0x230   :  { %v1025_v7 = vpop.eup %1024  ;;  %v523_v51 = vadd.f32 %v517_v3, %v516_v12  ;;  %v567_v6 = vcvt.s32.f32 %v565_v58  ;;  %v551_v9 = vcvt.s32.f32 %v549_v63  ;;  %v1676_v3 = vsub.f32 %v1374_v42, %v1391_v49  ;;  %v425_v42 = vld [vmem:[#allocation3 + $0x10] sm:$0xff] }
 0x231   :  { %1034 = vpow2.f32 %v783_v59  ;;  %v676_v39 = vadd.f32 %v1025_v7, %v1023_v27  ;;  %v703_v34 = vmul.f32 %v1025_v7, %v697_v25 }
 0x232   :  { %1036 = vpow2.f32 %v785_v33  ;;  %v1513_v54 = vpop.xlane.xlu1 %569  ;;  %v556_v14 = vsel %vm555_vm9, %v551_v9, inf  ;;  %v745_v20 = vmul.f32 1.442695, %v1676_v3 }
 0x233   :  { %v1027_v48 = vpop.eup %1026  ;;  %677 = vadd.xlane.f32.xlu1 %v676_v39  ;;  %v700_v39 = vmul.f32 %v1019_v16, %v694_v37  ;;  %vm571_vm8 = vcmp.eq.f32.partialorder %v1463_v50, %v1513_v54  ;;  %v1674_v37 = vsub.f32 %v1328_v23, %v1355_v31  ;;  %v424_v31 = vld [vmem:[#allocation3 + $0x8] sm:$0xff] }
 0x234   :  { %v1029_v60 = vpop.eup %1028  ;;  %v572_v11 = vsel %vm571_vm8, %v567_v6, inf  ;;  %v1679_v6 = vsub.f32 %v1420_v4, %v1426_v10 }
 0x235   :  { %v790_v32 = vadd.f32 %v1029_v60, %v1027_v48  ;;  %v701_v48 = vmul.f32 %v1021_v36, %v695_v5  ;;  %v526_v36 = vadd.f32 %v519_v61, %v518_v53  ;;  %v702_v60 = vmul.f32 %v1023_v27, %v696_v22 }
 0x236   :  { %v486_v35 = vpop.xlane.xlu1 %485  ;;  %v421_v5 = vmul.f32 1.442695, %v1674_v37  ;;  %v632_v9 = vmul.f32 1.442695, %v1679_v6 }
 0x237   :  { %v1031_v45 = vpop.eup %1030  ;;  %v491_v26 = vadd.f32 %v486_v35, %v479_v57  ;;  %791 = vadd.xlane.f32.xlu0 %v790_v32  ;;  %v706_v16 = vadd.f32 %v701_v48, %v700_v39  ;;  %v709_v2 = vadd.f32 %v703_v34, %v702_v60  ;;  %v478_v57 = vld [vmem:[#allocation4] sm:$0xff]  ;;  %v423_v39 = vld [vmem:[#allocation3] sm:$0xff] }
 0x238   :  { %v1033_v21 = vpop.eup %1032  ;;  %v704_v18 = vmul.f32 %v1031_v45, %v698_v38 }
 0x239   :  { %494 = vst.msk [vmem:[#allocation4 + $0x8] sm:$0xff] %vm26_vm1, %v491_v26  ;;  %v679_v29 = vadd.f32 %v1033_v21, %v1031_v45  ;;  %v705_v30 = vmul.f32 %v1033_v21, %v699_v41  ;;  %v417_v26 = vmul.f32 1.442695, %v1672_v8  ;;  %v1673_v21 = vsub.f32 %v1351_v28, %v1379_v44  ;;  %v667_v41 = vld [vmem:[#allocation8] sm:$0xff] }
 0x23b   :  { %v1035_v59 = vpop.eup %1034  ;;  %680 = vadd.xlane.f32.xlu0 %v679_v29  ;;  %v712_v0 = vadd.f32 %v705_v30, %v704_v18  ;;  %1038 = vpow2.f32 %v417_v26  ;;  %v1675_v29 = vsub.f32 %v1384_v47, %v1401_v55  ;;  %v1677_v55 = vsub.f32 %v1394_v52, %v1412_v62  ;;  %v739_v62 = vld [vmem:[#allocation10] sm:$0xff] }
 0x23c   :  { %v1037_v33 = vpop.eup %1036  ;;  %v1678_v30 = vsub.f32 %v1432_v13, %v1439_v17 }
 0x23d   :  { %v793_v56 = vadd.f32 %v1037_v33, %v1035_v59  ;;  %v628_v12 = vmul.f32 1.442695, %v1675_v29  ;;  %v496_v59 = vld [vmem:[#allocation5] sm:$0xff]  ;;  %v630_v53 = vmul.f32 1.442695, %v1677_v55  ;;  %v817_v29 = vld [vmem:[#allocation2] sm:$0xff] }
 0x23e   :  { %v747_v60 = vmul.f32 1.442695, %v1678_v30 }
 0x23f   :  { %524 = vadd.xlane.f32.xlu0 %v523_v51  ;;  %794 = vadd.xlane.f32.xlu1 %v793_v56 }
 0x240   :  { %v830_v6 = vld [vmem:[#allocation4 + $0x8] sm:$0xff] }
 0x243   :  { %707 = vadd.xlane.f32.xlu0 %v706_v16  ;;  %527 = vadd.xlane.f32.xlu1 %v526_v36 }
 0x245   :  { %v1039_v44 = vpop.eup %1038 }
 0x246   :  { %v426_v56 = vmul.f32 %v1039_v44, %v423_v39 }
 0x247   :  { %713 = vadd.xlane.f32.xlu0 %v712_v0  ;;  %710 = vadd.xlane.f32.xlu1 %v709_v2 }
 0x24b   :  { %573 = vmin.xlane.f32.xlu0 %v572_v11  ;;  %557 = vmin.xlane.f32.xlu1 %v556_v14  ;;  %v1680_v14 = vld [vmem:[#allocation15_spill] sm:$0xff] }
 0x24c   :  { %v1681_v43 = vsub.f32 %v1414_v1, %v1680_v14  ;;  %v690_v14 = vld [vmem:[#allocation11 + $0x10] sm:$0xff] }
 0x259   :  { %v1545_v27 = vpop.xlane.xlu0 %585 }
 0x25a   :  { %vm587_vm10 = vcmp.eq.f32.partialorder %v1480_v19, %v1545_v27  ;;  %v419_v19 = vmul.f32 1.442695, %v1673_v21 }
 0x25b   :  { %v588_v7 = vsel %vm587_vm10, %v583_v40, inf  ;;  %v749_v40 = vmul.f32 1.442695, %v1681_v43 }
 0x25c   :  { %589 = vmin.xlane.f32.xlu1 %v588_v7  ;;  %1040 = vpow2.f32 %v419_v19 }
 0x25d   :  { %v483_v50 = vpop.xlane.xlu0 %482  ;;  %1042 = vpow2.f32 %v421_v5  ;;  %v669_v5 = vld [vmem:[#allocation8 + $0x10] sm:$0xff] }
 0x25e   :  { %v490_v32 = vadd.f32 %v483_v50, %v478_v57  ;;  %1044 = vpow2.f32 %v628_v12  ;;  %v668_v57 = vld [vmem:[#allocation8 + $0x8] sm:$0xff] }
 0x25f   :  { %1046 = vpow2.f32 %v745_v20 }
 0x260   :  { %493 = vst.msk [vmem:[#allocation4] sm:$0xff] %vm26_vm1, %v490_v32  ;;  %1048 = vpow2.f32 %v630_v53 }
 0x261   :  { %v489_v35 = vpop.xlane.xlu0 %488  ;;  %1050 = vpow2.f32 %v747_v60 }
 0x262   :  { %v492_v45 = vadd.f32 %v489_v35, %v480_v46  ;;  %v740_v35 = vld [vmem:[#allocation10 + $0x8] sm:$0xff] }
 0x264   :  { %495 = vst.msk [vmem:[#allocation4 + $0x10] sm:$0xff] %vm26_vm1, %v492_v45 }
 0x266   :  { %v1041_v51 = vpop.eup %1040 }
 0x267   :  { %v1043_v47 = vpop.eup %1042  ;;  %v427_v22 = vmul.f32 %v1041_v51, %v424_v31  ;;  %v829_v26 = vld [vmem:[#allocation4] sm:$0xff] }
 0x268   :  { %v1570_v25 = vpop.eup %1044  ;;  %v428_v36 = vmul.f32 %v1043_v47, %v425_v42  ;;  %v832_v3 = vmul.f32 0.00390625, %v829_v26  ;;  %v741_v47 = vld [vmem:[#allocation10 + $0x10] sm:$0xff] }
 0x269   :  { %v1047_v18 = vpop.eup %1046  ;;  %v670_v58 = vmul.f32 %v1570_v25, %v667_v41 }
 0x26a   :  { %v751_v2 = vmul.f32 %v1047_v18, %v739_v62  ;;  %v1587_v7 = vpop.eup %1048  ;;  %v688_v18 = vld [vmem:[#allocation11] sm:$0xff] }
 0x26b   :  { %v671_v4 = vmul.f32 %v1587_v7, %v668_v57  ;;  %v1051_v10 = vpop.eup %1050 }
 0x26c   :  { %v752_v1 = vmul.f32 %v1051_v10, %v740_v35  ;;  %v831_v10 = vld [vmem:[#allocation4 + $0x10] sm:$0xff] }
 0x2aa   :  { %v522_v33 = vpop.xlane.xlu1 %521 }
 0x2ab   :  { %v529_v48 = vadd.f32 %v522_v33, %v496_v59 }
 0x2ad   :  { %532 = vst.msk [vmem:[#allocation5] sm:$0xff] %vm26_vm1, %v529_v48 }
 0x2ae   :  { %v464_v61 = vpop.xlane.xlu1 %463 }
 0x2af   :  { %v471_v49 = vadd.f32 %v464_v61, %v426_v56 }
 0x2b0   :  { %v467_v38 = vpop.xlane.xlu0 %466 }
 0x2b1   :  { %475 = vst.msk [vmem:[#allocation3] sm:$0xff] %vm26_vm1, %v471_v49  ;;  %v472_v16 = vadd.f32 %v467_v38, %v427_v22  ;;  %v497_v49 = vld [vmem:[#allocation5 + $0x8] sm:$0xff] }
 0x2b2   :  { %v470_v52 = vpop.xlane.xlu1 %469 }
 0x2b3   :  { %476 = vst.msk [vmem:[#allocation3 + $0x8] sm:$0xff] %vm26_vm1, %v472_v16  ;;  %v473_v34 = vadd.f32 %v470_v52, %v428_v36 }
 0x2b4   :  { %v675_v63 = vpop.xlane.xlu0 %674  ;;  %v823_v44 = vld [vmem:[#allocation5] sm:$0xff] }
 0x2b5   :  { %477 = vst.msk [vmem:[#allocation3 + $0x10] sm:$0xff] %vm26_vm1, %v473_v34  ;;  %v682_v0 = vadd.f32 %v675_v63, %v670_v58  ;;  %v498_v63 = vld [vmem:[#allocation5 + $0x10] sm:$0xff] }
 0x2b6   :  { %v789_v11 = vpop.xlane.xlu1 %788 }
 0x2b7   :  { %685 = vst.msk [vmem:[#allocation8] sm:$0xff] %vm26_vm1, %v682_v0  ;;  %v796_v13 = vadd.f32 %v789_v11, %v751_v2  ;;  %v691_v0 = vmul.f32 %v1570_v25, %v688_v18  ;;  %v689_v2 = vld [vmem:[#allocation11 + $0x8] sm:$0xff]  ;;  %v833_v25 = vmul.f32 0.00390625, %v830_v6 }
 0x2b8   :  { %v808_v17 = vld [vmem:[#allocation3] sm:$0xff] }
 0x2b9   :  { %1052 = vlog2.f32 %v808_v17  ;;  %799 = vst.msk [vmem:[#allocation10] sm:$0xff] %vm26_vm1, %v796_v13 }
 0x2ba   :  { %1054 = vpow2.f32 %v632_v9  ;;  %v809_v50 = vld [vmem:[#allocation3 + $0x8] sm:$0xff]  ;;  %v818_v9 = vld [vmem:[#allocation2 + $0x8] sm:$0xff] }
 0x2bb   :  { %1056 = vpow2.f32 %v749_v40 }
 0x2bc   :  { %1058 = vlog2.f32 %v809_v50  ;;  %v810_v32 = vld [vmem:[#allocation3 + $0x10] sm:$0xff] }
 0x2bd   :  { %1060 = vlog2.f32 %v810_v32  ;;  %v819_v32 = vld [vmem:[#allocation2 + $0x10] sm:$0xff] }
 0x2be   :  { %v859_v59 = vld [vmem:[#allocation8] sm:$0xff] }
 0x2bf   :  { %1062 = vlog2.f32 %v859_v59 }
 0x2c0   :  { %v678_v46 = vpop.xlane.xlu1 %677  ;;  %v874_v31 = vld [vmem:[#allocation10] sm:$0xff] }
 0x2c1   :  { %v683_v45 = vadd.f32 %v678_v46, %v671_v4  ;;  %1064 = vlog2.f32 %v874_v31  ;;  %v692_v46 = vmul.f32 %v1587_v7, %v689_v2 }
 0x2c3   :  { %v1053_v8 = vpop.eup %1052  ;;  %686 = vst.msk [vmem:[#allocation8 + $0x8] sm:$0xff] %vm26_vm1, %v683_v45  ;;  %v560_v45 = vcvt.f32.s32 %v1491_v15 }
 0x2c4   :  { %v1591_v21 = vpop.eup %1054  ;;  %v812_v19 = vmul.f32 0.6931472, %v1053_v8  ;;  %v792_v37 = vpop.xlane.xlu0 %791 }
 0x2c5   :  { %v797_v12 = vadd.f32 %v792_v37, %v752_v1  ;;  %v672_v33 = vmul.f32 %v1591_v21, %v669_v5  ;;  %v1057_v39 = vpop.eup %1056  ;;  %v693_v35 = vmul.f32 %v1591_v21, %v690_v14  ;;  %v561_v15 = vshll.u32 %v560_v45, 16 }
 0x2c6   :  { %v820_v20 = vadd.f32 %v817_v29, %v812_v19  ;;  %v1059_v53 = vpop.eup %1058  ;;  %v753_v38 = vmul.f32 %v1057_v39, %v741_v47 }
 0x2c7   :  { %800 = vst.msk [vmem:[#allocation10 + $0x8] sm:$0xff] %vm26_vm1, %v797_v12  ;;  %v1061_v30 = vpop.eup %1060  ;;  %v814_v52 = vmul.f32 0.6931472, %v1059_v53  ;;  %v576_v12 = vcvt.f32.s32 %v1513_v54 }
 0x2c8   :  { %v826_v48 = vsub.f32 %v823_v44, %v820_v20  ;;  %v835_v51 = vsub.f32 %v832_v3, %v820_v20  ;;  %v681_v56 = vpop.xlane.xlu0 %680  ;;  %v816_v11 = vmul.f32 0.6931472, %v1061_v30  ;;  %v834_v3 = vmul.f32 0.00390625, %v831_v10 }
 0x2c9   :  { %v684_v55 = vadd.f32 %v681_v56, %v672_v33  ;;  %v821_v43 = vadd.f32 %v818_v9, %v814_v52  ;;  %v1063_v4 = vpop.eup %1062  ;;  %v868_v56 = vld [vmem:[#allocation7] sm:$0xff] }
 0x2ca   :  { %v838_v61 = vmul.f32 0.9, %v826_v48  ;;  %v841_v42 = vmul.f32 0.1, %v835_v51  ;;  %v860_v22 = vld [vmem:[#allocation8 + $0x8] sm:$0xff]  ;;  %v822_v8 = vadd.f32 %v819_v32, %v816_v11  ;;  %v870_v32 = vld [vmem:[#allocation7 + $0x10] sm:$0xff] }
 0x2cb   :  { %687 = vst.msk [vmem:[#allocation8 + $0x10] sm:$0xff] %vm26_vm1, %v684_v55  ;;  %1066 = vlog2.f32 %v860_v22  ;;  %v1065_v19 = vpop.eup %1064  ;;  %v836_v37 = vsub.f32 %v833_v25, %v821_v43  ;;  %v863_v20 = vmul.f32 0.6931472, %v1063_v4 }
 0x2cc   :  { %v844_v41 = vadd.f32 %v841_v42, %v838_v61  ;;  %v795_v16 = vpop.xlane.xlu1 %794  ;;  %v525_v36 = vpop.xlane.xlu0 %524  ;;  %v878_v21 = vmul.f32 0.6931472, %v1065_v19  ;;  %v837_v39 = vsub.f32 %v834_v3, %v822_v8  ;;  %v577_v42 = vshll.u32 %v576_v12, 16  ;;  %v885_v12 = vld [vmem:[#allocation9 + $0x10] sm:$0xff] }
 0x2cd   :  { %v798_v60 = vadd.f32 %v795_v16, %v753_v38  ;;  %v530_v62 = vadd.f32 %v525_v36, %v497_v49  ;;  %v842_v47 = vmul.f32 0.1, %v836_v37  ;;  %v871_v38 = vadd.f32 %v868_v56, %v863_v20  ;;  %v598_v16 = vld [vmem:[#allocation6] sm:$0xff]  ;;  %v883_v36 = vld [vmem:[#allocation9] sm:$0xff] }
 0x2ce   :  { %v847_v34 = vsub.f32 0.0, %v844_v41  ;;  %v875_v58 = vld [vmem:[#allocation10 + $0x8] sm:$0xff] }
 0x2cf   :  { %1068 = vlog2.f32 %v875_v58  ;;  %801 = vst.msk [vmem:[#allocation10 + $0x10] sm:$0xff] %vm26_vm1, %v798_v60  ;;  %533 = vst.msk [vmem:[#allocation5 + $0x8] sm:$0xff] %vm26_vm1, %v530_v62  ;;  %v599_v62 = vld [vmem:[#allocation6 + $0x8] sm:$0xff]  ;;  %v886_v58 = vadd.f32 %v883_v36, %v878_v21 }
 0x2d0   :  { %1070 = vrcp.f32 %v859_v59  ;;  %850 = vst.msk [vmem:[%s1661_s5] sm:$0xff] %vm26_vm1, %v847_v34  ;;  %v528_v13 = vpop.xlane.xlu1 %527  ;;  %v708_v17 = vpop.xlane.xlu0 %707 }
 0x2d1   :  { %v531_v40 = vadd.f32 %v528_v13, %v498_v63  ;;  %v715_v57 = vadd.f32 %v708_v17, %v691_v0  ;;  %1072 = vrcp.f32 %v860_v22  ;;  %v843_v0 = vmul.f32 0.1, %v837_v39 }
 0x2d2   :  { %v861_v50 = vld [vmem:[#allocation8 + $0x10] sm:$0xff] }
 0x2d3   :  { %1074 = vlog2.f32 %v861_v50  ;;  %534 = vst.msk [vmem:[#allocation5 + $0x10] sm:$0xff] %vm26_vm1, %v531_v40  ;;  %718 = vst.msk [vmem:[#allocation11] sm:$0xff] %vm26_vm1, %v715_v57  ;;  %v869_v40 = vld [vmem:[#allocation7 + $0x8] sm:$0xff] }
 0x2d4   :  { %1076 = vrcp.f32 %v861_v50  ;;  %v711_v26 = vpop.xlane.xlu1 %710  ;;  %v714_v1 = vpop.xlane.xlu0 %713 }
 0x2d5   :  { %v716_v5 = vadd.f32 %v711_v26, %v692_v46  ;;  %v717_v29 = vadd.f32 %v714_v1, %v693_v35  ;;  %v1067_v33 = vpop.eup %1066 }
 0x2d6   :  { %v876_v59 = vld [vmem:[#allocation10 + $0x10] sm:$0xff]  ;;  %v865_v49 = vmul.f32 0.6931472, %v1067_v33  ;;  %v592_v33 = vcvt.f32.s32 %v1545_v27 }
 0x2d7   :  { %v824_v44 = vld [vmem:[#allocation5 + $0x8] sm:$0xff]  ;;  %1078 = vlog2.f32 %v876_v59  ;;  %719 = vst.msk [vmem:[#allocation11 + $0x8] sm:$0xff] %vm26_vm1, %v716_v5  ;;  %720 = vst.msk [vmem:[#allocation11 + $0x10] sm:$0xff] %vm26_vm1, %v717_v29 }
 0x2d8   :  { %v827_v7 = vsub.f32 %v824_v44, %v821_v43  ;;  %v558_v48 = vpop.xlane.xlu1 %557  ;;  %v574_v51 = vpop.xlane.xlu0 %573  ;;  %v872_v35 = vadd.f32 %v869_v40, %v865_v49  ;;  %v593_v39 = vshll.u32 %v592_v33, 16 }
 0x2d9   :  { %v1069_v31 = vpop.eup %1068  ;;  %v559_v55 = vcvt.f32.s32 %v558_v48  ;;  %v575_v53 = vcvt.f32.s32 %v574_v51  ;;  %v600_v48 = vld [vmem:[#allocation6 + $0x10] sm:$0xff] }
 0x2da   :  { %v839_v54 = vmul.f32 0.9, %v827_v7  ;;  %v1071_v61 = vpop.eup %1070  ;;  %v825_v22 = vld [vmem:[#allocation5 + $0x10] sm:$0xff]  ;;  %v880_v63 = vmul.f32 0.6931472, %v1069_v31 }
 0x2db   :  { %v889_v41 = vld [vmem:[#allocation11] sm:$0xff]  ;;  %v828_v30 = vsub.f32 %v825_v22, %v822_v8  ;;  %v562_v52 = vadd.s32 %v561_v15, %v559_v55  ;;  %v1073_v34 = vpop.eup %1072  ;;  %v578_v2 = vadd.s32 %v577_v42, %v575_v53  ;;  %v884_v8 = vld [vmem:[#allocation9 + $0x8] sm:$0xff] }
 0x2dc   :  { %v845_v18 = vadd.f32 %v842_v47, %v839_v54  ;;  %v893_v60 = vmul.f32 %v1071_v61, %v889_v41  ;;  %v887_v37 = vadd.f32 %v884_v8, %v880_v63 }
 0x2dd   :  { %v1075_v6 = vpop.eup %1074  ;;  %v840_v11 = vmul.f32 0.9, %v828_v30  ;;  %v601_v14 = vsel %vm595_vm5, %v562_v52, %v598_v16  ;;  %v602_v10 = vsel %vm596_vm7, %v578_v2, %v599_v62 }
 0x2de   :  { %v848_v9 = vsub.f32 0.0, %v845_v18  ;;  %v898_v13 = vsub.f32 %v893_v60, %v871_v38  ;;  %v1077_v43 = vpop.eup %1076  ;;  %v867_v57 = vmul.f32 0.6931472, %v1075_v6  ;;  %v890_v50 = vld [vmem:[#allocation11 + $0x8] sm:$0xff]  ;;  %v891_v4 = vld [vmem:[#allocation11 + $0x10] sm:$0xff]  ;;  %604 = vst.msk [vmem:[#allocation6] sm:$0xff] %vm26_vm1, %v601_v14 }
 0x2df   :  { %v846_v46 = vadd.f32 %v843_v0, %v840_v11  ;;  %v895_v45 = vmul.f32 %v1073_v34, %v890_v50  ;;  %605 = vst.msk [vmem:[#allocation6 + $0x8] sm:$0xff] %vm26_vm1, %v602_v10  ;;  %v897_v1 = vmul.f32 %v1077_v43, %v891_v4 }
 0x2e0   :  { %851 = vst.msk [vmem:[%s1661_s5 + $0x8] sm:$0xff] %vm26_vm1, %v848_v9  ;;  %v901_v24 = vadd.f32 %v898_v13, %v886_v58  ;;  %v873_v26 = vadd.f32 %v870_v32, %v867_v57 }
 0x2e1   :  { %v1079_v19 = vpop.eup %1078  ;;  %v849_v5 = vsub.f32 0.0, %v846_v46  ;;  %v899_v28 = vsub.f32 %v895_v45, %v872_v35 }
 0x2e2   :  { %904 = vst.msk [vmem:[%s1662_s7] sm:$0xff] %vm26_vm1, %v901_v24  ;;  %v882_v29 = vmul.f32 0.6931472, %v1079_v19  ;;  %v900_v59 = vsub.f32 %v897_v1, %v873_v26 }
 0x2e3   :  { %852 = vst.msk [vmem:[%s1661_s5 + $0x10] sm:$0xff] %vm26_vm1, %v849_v5  ;;  %v902_v3 = vadd.f32 %v899_v28, %v887_v37 }
 0x2e4   :  { %v888_v20 = vadd.f32 %v885_v12, %v882_v29 }
 0x2e5   :  { %905 = vst.msk [vmem:[%s1662_s7 + $0x8] sm:$0xff] %vm26_vm1, %v902_v3  ;;  %v853_v44 = vld [vmem:[#allocation6] sm:$0xff] }
 0x2e6   :  { %v903_v7 = vadd.f32 %v900_v59, %v888_v20  ;;  %856 = vst.msk [vmem:[%s1663_s6] sm:$0xff] %vm26_vm1, %v853_v44  ;;  %v854_v15 = vld [vmem:[#allocation6 + $0x8] sm:$0xff] }
 0x2e7   :  { %857 = vst.msk [vmem:[%s1663_s6 + $0x8] sm:$0xff] %vm26_vm1, %v854_v15 }
 0x2e8   :  { %906 = vst.msk [vmem:[%s1662_s7 + $0x10] sm:$0xff] %vm26_vm1, %v903_v7 }
 0x2e9   :  { %v590_v21 = vpop.xlane.xlu1 %589 }
 0x2ea   :  { %v591_v27 = vcvt.f32.s32 %v590_v21 }
 0x2ec   :  { %v594_v51 = vadd.s32 %v593_v39, %v591_v27 }
 0x2ee   :  { %v603_v56 = vsel %vm597_vm2, %v594_v51, %v600_v48 }
 0x2ef   :  { %606 = vst.msk [vmem:[#allocation6 + $0x10] sm:$0xff] %vm26_vm1, %v603_v56 }
 0x2f6   :  { %v855_v47 = vld [vmem:[#allocation6 + $0x10] sm:$0xff] }
 0x2f7   :  { %858 = vst.msk [vmem:[%s1663_s6 + $0x10] sm:$0xff] %vm26_vm1, %v855_v47 }

</bundles_post_ra>
